<compile_context>
chip_gen: v7x
topology: tpu7x:2x2x1
jax: 0.10.0
libtpu: 0.0.40
codegen_flags: <defaults>
</compile_context>

<pallas_src>
import functools

import numpy as np
import jax
import jax.numpy as jnp
from jax.experimental import pallas as pl
from jax.experimental.pallas import tpu as pltpu

EPS = 1e-5
_SQRT2_INV = 0.7071067811865476
_GELU_C = 0.7978845608028654      # sqrt(2/pi)
_GELU_A = 0.044715


# ----------------------------------------------------------------------------
# small helpers
# ----------------------------------------------------------------------------
def _dot(a, b):
    # MXU matmul with f32 accumulation (callers cast operands to bf16).
    return jnp.dot(a, b, preferred_element_type=jnp.float32)


def _gelu_tanh(x):
    # tanh-form GELU (EUP tanh + ~5 VALU ops); ~3e-4 abs deviation from exact erf GELU.
    return 0.5 * x * (1.0 + jnp.tanh(_GELU_C * (x + _GELU_A * x * x * x)))


def _gelu_ref(x):
    # exact erf GELU (torch.nn.functional.gelu default) for the pure-JAX reference
    return 0.5 * x * (1.0 + jax.scipy.special.erf(x * _SQRT2_INV))


def dft2_matrices(H, W):
    """Stacked real/imag 2-D 'ortho' DFT operators on the row-major flattened (H, W).

    X_flat = x_flat @ M with M = kron(F_H, F_W) / sqrt(H*W);
    Re(ifft2_ortho(Z)) = Zr @ M.real + Zi @ M.imag.
    Returns fwd (S, 2S) = [M.real | M.imag] and inv (2S, S) = [[M.real], [M.imag]].
    """
    kh = np.arange(H)
    kw = np.arange(W)
    fh = np.exp(-2j * np.pi * np.outer(kh, kh) / H)
    fw = np.exp(-2j * np.pi * np.outer(kw, kw) / W)
    m = np.kron(fh, fw) / np.sqrt(H * W)
    fwd = np.concatenate([m.real, m.imag], axis=1).astype(np.float32)   # (S, 2S)
    inv = np.concatenate([m.real, m.imag], axis=0).astype(np.float32)   # (2S, S)
    return fwd, inv


# ----------------------------------------------------------------------------
# fused kernel: norm1 + AFNO (2-D DFT, per-freq MLP, iDFT) + skip1 + norm2 + MLP + skip2
# ----------------------------------------------------------------------------
def _afno_block_kernel(x_ref, g1_ref, bt1_ref, g2_ref, bt2_ref,
                       dftf_ref, dfti_ref,
                       mw1t_ref, mb1_ref, mw2t_ref, mb2_ref,
                       aw1_ref, ab1_ref, aw2_ref, ab2_ref,
                       o_ref, *, hidden, do_norm, do_skip1, do_skip2):
    _, C, S = x_ref.shape
    x = x_ref[0].astype(jnp.float32)                          # (C, S), lane-dense

    # ---- norm1: LayerNorm over the channel axis (leading-axis reduction, pure VALU)
    if do_norm:
        m = jnp.mean(x, axis=0, keepdims=True)                # (1, S)
        v = jnp.mean((x - m) ** 2, axis=0, keepdims=True)
        h = (x - m) * jax.lax.rsqrt(v + EPS) * g1_ref[...] + bt1_ref[...]
    else:
        h = x

    # ---- forward 2-D DFT ('ortho'): one stacked real|imag MXU matmul, K=S
    spec = _dot(h.astype(jnp.bfloat16), dftf_ref[...])        # (C, 2S) f32
    xr = spec[:, :S]
    xi = spec[:, S:]

    # ---- per-frequency MLP 2 -> hidden -> 2 (f32 VPU; SMEM scalar weights, broadcasts
    #      amortized over all C planes; minor dim S is lane-dense)
    zr = jnp.zeros_like(xr) + ab2_ref[0]
    zi = jnp.zeros_like(xi) + ab2_ref[1]
    for k in range(hidden):
        hk = _gelu_tanh(xr * aw1_ref[0, k] + xi * aw1_ref[1, k] + ab1_ref[k])
        zr = zr + hk * aw2_ref[k, 0]
        zi = zi + hk * aw2_ref[k, 1]

    # ---- inverse 2-D DFT, real part only: one stacked MXU matmul, K=2S
    z = jnp.concatenate([zr, zi], axis=1).astype(jnp.bfloat16)    # (C, 2S)
    y = _dot(z, dfti_ref[...])                                     # (C, S)
    if do_skip1:
        y = y + x                                                  # fused skip_one

    # ---- norm2 + channel MLP in transposed form (hidden, C) @ (C, S) + skip_two
    if do_norm:
        m2 = jnp.mean(y, axis=0, keepdims=True)
        v2 = jnp.mean((y - m2) ** 2, axis=0, keepdims=True)
        h2 = (y - m2) * jax.lax.rsqrt(v2 + EPS) * g2_ref[...] + bt2_ref[...]
    else:
        h2 = y
    h1 = _gelu_tanh(_dot(mw1t_ref[...], h2.astype(jnp.bfloat16)) + mb1_ref[...])
    out = _dot(mw2t_ref[...], h1.astype(jnp.bfloat16)) + mb2_ref[...]
    if do_skip2:
        out = out + y                                              # fused skip_two
    o_ref[0] = out.astype(o_ref.dtype)


def afno_transformer_block(x, p, *, norm=True, skip_one=True, skip_two=True):
    B, C, H, W = x.shape
    S = H * W
    hidden = p["afno_w1"].shape[1]
    hid_mlp = p["mlp_w1_t"].shape[0]
    kern = functools.partial(_afno_block_kernel, hidden=hidden, do_norm=norm,
                             do_skip1=skip_one, do_skip2=skip_two)
    smem = pl.BlockSpec(memory_space=pltpu.MemorySpace.SMEM)

    def const(shape):
        # grid-invariant operand (constant index_map)
        return pl.BlockSpec(shape, lambda b: tuple(0 for _ in shape))

    y = pl.pallas_call(
        kern,
        out_shape=jax.ShapeDtypeStruct((B, C, S), x.dtype),
        grid=(B,),
        in_specs=[
            pl.BlockSpec((1, C, S), lambda b: (b, 0, 0)),          # x (lane-dense)
            const((C, 1)), const((C, 1)),                          # norm1 gamma/beta
            const((C, 1)), const((C, 1)),                          # norm2 gamma/beta
            const((S, 2 * S)),                                     # stacked fwd 2-D DFT
            const((2 * S, S)),                                     # stacked inv 2-D DFT
            const((hid_mlp, C)), const((hid_mlp, 1)),              # channel-MLP W1^T, b1
            const((C, hid_mlp)), const((C, 1)),                    # channel-MLP W2^T, b2
            smem, smem, smem, smem,                                # per-freq MLP scalars
        ],
        out_specs=pl.BlockSpec((1, C, S), lambda b: (b, 0, 0)),
        compiler_params=pltpu.CompilerParams(
            dimension_semantics=("parallel",)),
    )(x.reshape(B, C, S),
      p["g1"].reshape(C, 1), p["bta1"].reshape(C, 1),
      p["g2"].reshape(C, 1), p["bta2"].reshape(C, 1),
      p["dft_fwd"], p["dft_inv"],
      p["mlp_w1_t"], p["mlp_b1"].reshape(hid_mlp, 1),
      p["mlp_w2_t"], p["mlp_b2"].reshape(C, 1),
      p["afno_w1"], p["afno_b1"], p["afno_w2"], p["afno_b2"])
    return y.reshape(B, C, H, W)


# ----------------------------------------------------------------------------
# parameter init (deterministic, PyTorch-Linear-style uniform) + pure-JAX reference
# ----------------------------------------------------------------------------
def init_params(key, dim, hidden_afno, hidden_mlp, H, W):
    ks = jax.random.split(key, 4)

    def lin(k, fan_in, fan_out):
        kw, kb = jax.random.split(k)
        bound = 1.0 / float(np.sqrt(fan_in))
        w = jax.random.uniform(kw, (fan_in, fan_out), jnp.float32, -bound, bound)
        b = jax.random.uniform(kb, (fan_out,), jnp.float32, -bound, bound)
        return w, b

    afno_w1, afno_b1 = lin(ks[0], 2, hidden_afno)
    afno_w2, afno_b2 = lin(ks[1], hidden_afno, 2)
    mlp_w1, mlp_b1 = lin(ks[2], dim, hidden_mlp)
    mlp_w2, mlp_b2 = lin(ks[3], hidden_mlp, dim)
    dft_fwd, dft_inv = dft2_matrices(H, W)
    return dict(
        afno_w1=afno_w1, afno_b1=afno_b1, afno_w2=afno_w2, afno_b2=afno_b2,
        mlp_w1=mlp_w1, mlp_b1=mlp_b1, mlp_w2=mlp_w2, mlp_b2=mlp_b2,
        # kernel-side derived params: transposed channel-MLP weights and stacked 2-D DFT
        # matrices as bf16 MXU operands (kernel accumulates in f32)
        mlp_w1_t=jnp.transpose(mlp_w1).astype(jnp.bfloat16),
        mlp_w2_t=jnp.transpose(mlp_w2).astype(jnp.bfloat16),
        g1=jnp.ones((dim,), jnp.float32), bta1=jnp.zeros((dim,), jnp.float32),
        g2=jnp.ones((dim,), jnp.float32), bta2=jnp.zeros((dim,), jnp.float32),
        dft_fwd=jnp.asarray(dft_fwd, jnp.bfloat16),
        dft_inv=jnp.asarray(dft_inv, jnp.bfloat16),
    )


def reference_forward(x, p, *, norm=True, skip_one=True, skip_two=True):
    B, C, H, W = x.shape

    def ln(v, g, b):
        m = v.mean(-1, keepdims=True)
        var = ((v - m) ** 2).mean(-1, keepdims=True)
        return (v - m) / jnp.sqrt(var + EPS) * g + b

    skip1 = x
    if norm:
        xp = jnp.transpose(x, (0, 2, 3, 1))
        x = jnp.transpose(ln(xp, p["g1"], p["bta1"]), (0, 3, 1, 2))
    xf = jnp.fft.fft2(x, norm="ortho")
    freq = jnp.stack([xf.real, xf.imag], axis=-1).reshape(-1, 2)
    freq = _gelu_ref(freq @ p["afno_w1"] + p["afno_b1"]) @ p["afno_w2"] + p["afno_b2"]
    freq = freq.reshape(B, C, H, W, 2)
    xf2 = freq[..., 0] + 1j * freq[..., 1]
    x = jnp.fft.ifft2(xf2, norm="ortho").real.astype(jnp.float32)
    if skip_one:
        x = x + skip1
    xp = jnp.transpose(x, (0, 2, 3, 1))
    skip2 = xp
    h = ln(xp, p["g2"], p["bta2"]) if norm else xp
    y = _gelu_ref(h.reshape(-1, C) @ p["mlp_w1"] + p["mlp_b1"]) @ p["mlp_w2"] + p["mlp_b2"]
    y = y.reshape(B, H, W, C)
    if skip_two:
        y = y + skip2
    return jnp.transpose(y, (0, 3, 1, 2))


if __name__ == "__main__":
    B, C, H, W = 2, 4, 16, 16
    hidden_dim_afno = 8
    mlp_ratio = 2.0

    key = jax.random.PRNGKey(0)
    kx, kp = jax.random.split(key)
    x = jax.random.normal(kx, (B, C, H, W), jnp.float32)
    params = init_params(kp, C, hidden_dim_afno, int(C * mlp_ratio), H, W)

    fwd = jax.jit(functools.partial(afno_transformer_block,
                                    norm=True, skip_one=True, skip_two=True))
    out = jax.block_until_ready(fwd(x, params))

    ref = reference_forward(x, params, norm=True, skip_one=True, skip_two=True)
    # bf16 MXU operands (with f32 accumulation) and tanh-GELU -> slightly looser
    # tolerance than pure f32
    np.testing.assert_allclose(np.asarray(out), np.asarray(ref), rtol=3e-2, atol=3e-2)

    print("KERNEL_OK")
</pallas_src>

<mosaic_0001>
module attributes {stable_mosaic.version = 11 : i64} {
  func.func @_afno_block_kernel(%arg0: i32, %arg1: memref<1x4x256xf32, #tpu.memory_space<vmem>>, %arg2: memref<4x1xf32, #tpu.memory_space<vmem>>, %arg3: memref<4x1xf32, #tpu.memory_space<vmem>>, %arg4: memref<4x1xf32, #tpu.memory_space<vmem>>, %arg5: memref<4x1xf32, #tpu.memory_space<vmem>>, %arg6: memref<256x512xbf16, #tpu.memory_space<vmem>>, %arg7: memref<512x256xbf16, #tpu.memory_space<vmem>>, %arg8: memref<8x4xbf16, #tpu.memory_space<vmem>>, %arg9: memref<8x1xf32, #tpu.memory_space<vmem>>, %arg10: memref<4x8xbf16, #tpu.memory_space<vmem>>, %arg11: memref<4x1xf32, #tpu.memory_space<vmem>>, %arg12: memref<2x8xf32, #tpu.memory_space<smem>>, %arg13: memref<8xf32, #tpu.memory_space<smem>>, %arg14: memref<8x2xf32, #tpu.memory_space<smem>>, %arg15: memref<2xf32, #tpu.memory_space<smem>>, %arg16: memref<1x4x256xf32, #tpu.memory_space<vmem>>) attributes {dimension_semantics = [#tpu.dimension_semantics<parallel>], iteration_bounds = array<i64: 2>, scalar_prefetch = 0 : i64, scratch_operands = 0 : i64, tpu.core_type = #tpu.core_type<tc>, window_params = [{transform_indices = @transform_0, window_bounds = array<i64: 1, 4, 256>}, {pipeline_mode = #tpu.pipeline_mode<synchronous>, transform_indices = @transform_1, window_bounds = array<i64: 4, 1>}, {pipeline_mode = #tpu.pipeline_mode<synchronous>, transform_indices = @transform_2, window_bounds = array<i64: 4, 1>}, {pipeline_mode = #tpu.pipeline_mode<synchronous>, transform_indices = @transform_3, window_bounds = array<i64: 4, 1>}, {pipeline_mode = #tpu.pipeline_mode<synchronous>, transform_indices = @transform_4, window_bounds = array<i64: 4, 1>}, {pipeline_mode = #tpu.pipeline_mode<synchronous>, transform_indices = @transform_5, window_bounds = array<i64: 256, 512>}, {pipeline_mode = #tpu.pipeline_mode<synchronous>, transform_indices = @transform_6, window_bounds = array<i64: 512, 256>}, {pipeline_mode = #tpu.pipeline_mode<synchronous>, transform_indices = @transform_7, window_bounds = array<i64: 8, 4>}, {pipeline_mode = #tpu.pipeline_mode<synchronous>, transform_indices = @transform_8, window_bounds = array<i64: 8, 1>}, {pipeline_mode = #tpu.pipeline_mode<synchronous>, transform_indices = @transform_9, window_bounds = array<i64: 4, 8>}, {pipeline_mode = #tpu.pipeline_mode<synchronous>, transform_indices = @transform_10, window_bounds = array<i64: 4, 1>}, {transform_indices = @transform_11, window_bounds = array<i64: 2, 8>}, {transform_indices = @transform_12, window_bounds = array<i64: 8>}, {transform_indices = @transform_13, window_bounds = array<i64: 8, 2>}, {transform_indices = @transform_14, window_bounds = array<i64: 2>}, {transform_indices = @transform_15, window_bounds = array<i64: 1, 4, 256>}]} {
    %c0 = arith.constant 0 : index
    %c0_0 = arith.constant 0 : index
    %c0_1 = arith.constant 0 : index
    %0 = vector.load %arg1[%c0, %c0_0, %c0_1] : memref<1x4x256xf32, #tpu.memory_space<vmem>>, vector<1x4x256xf32>
    %1 = vector.shape_cast %0 : vector<1x4x256xf32> to vector<4x256xf32>
    %cst = arith.constant dense<0.000000e+00> : vector<256xf32>
    %2 = vector.multi_reduction <add>, %1, %cst [0] : vector<4x256xf32> to vector<256xf32>
    %3 = vector.shape_cast %2 : vector<256xf32> to vector<1x256xf32>
    %cst_2 = arith.constant 4.000000e+00 : f32
    %4 = vector.broadcast %cst_2 : f32 to vector<1x256xf32>
    %5 = arith.divf %3, %4 : vector<1x256xf32>
    %6 = vector.broadcast %5 : vector<1x256xf32> to vector<4x256xf32>
    %7 = arith.subf %1, %6 : vector<4x256xf32>
    %8 = arith.mulf %7, %7 : vector<4x256xf32>
    %cst_3 = arith.constant dense<0.000000e+00> : vector<256xf32>
    %9 = vector.multi_reduction <add>, %8, %cst_3 [0] : vector<4x256xf32> to vector<256xf32>
    %10 = vector.shape_cast %9 : vector<256xf32> to vector<1x256xf32>
    %cst_4 = arith.constant 4.000000e+00 : f32
    %11 = vector.broadcast %cst_4 : f32 to vector<1x256xf32>
    %12 = arith.divf %10, %11 : vector<1x256xf32>
    %13 = vector.broadcast %5 : vector<1x256xf32> to vector<4x256xf32>
    %14 = arith.subf %1, %13 : vector<4x256xf32>
    %cst_5 = arith.constant 9.99999974E-6 : f32
    %15 = vector.broadcast %cst_5 : f32 to vector<1x256xf32>
    %16 = arith.addf %12, %15 : vector<1x256xf32>
    %17 = math.rsqrt %16 : vector<1x256xf32>
    %18 = vector.broadcast %17 : vector<1x256xf32> to vector<4x256xf32>
    %19 = arith.mulf %14, %18 : vector<4x256xf32>
    %c0_6 = arith.constant 0 : index
    %c0_7 = arith.constant 0 : index
    %20 = vector.load %arg2[%c0_6, %c0_7] : memref<4x1xf32, #tpu.memory_space<vmem>>, vector<4x1xf32>
    %21 = vector.broadcast %20 : vector<4x1xf32> to vector<4x256xf32>
    %22 = arith.mulf %19, %21 : vector<4x256xf32>
    %c0_8 = arith.constant 0 : index
    %c0_9 = arith.constant 0 : index
    %23 = vector.load %arg3[%c0_8, %c0_9] : memref<4x1xf32, #tpu.memory_space<vmem>>, vector<4x1xf32>
    %24 = vector.broadcast %23 : vector<4x1xf32> to vector<4x256xf32>
    %25 = arith.addf %22, %24 : vector<4x256xf32>
    %26 = arith.truncf %25 : vector<4x256xf32> to vector<4x256xbf16>
    %c0_10 = arith.constant 0 : index
    %c0_11 = arith.constant 0 : index
    %27 = vector.load %arg6[%c0_10, %c0_11] : memref<256x512xbf16, #tpu.memory_space<vmem>>, vector<256x512xbf16>
    %cst_12 = arith.constant dense<0.000000e+00> : vector<4x512xf32>
    %28 = tpu.matmul %26, %27, %cst_12 {dimension_numbers = #tpu.dot_dimension_numbers<[1], [0], [0], [1], [0, 0, 1, 1], [], []>} : vector<4x256xbf16>, vector<256x512xbf16>, vector<4x512xf32> -> vector<4x512xf32>
    %29 = vector.extract_strided_slice %28 {offsets = [0, 0], sizes = [4, 256], strides = [1, 1]} : vector<4x512xf32> to vector<4x256xf32>
    %30 = vector.extract_strided_slice %28 {offsets = [0, 256], sizes = [4, 256], strides = [1, 1]} : vector<4x512xf32> to vector<4x256xf32>
    %cst_13 = arith.constant 0.000000e+00 : f32
    %31 = vector.broadcast %cst_13 : f32 to vector<4x256xf32>
    %c0_14 = arith.constant 0 : index
    %32 = memref.load %arg15[%c0_14] : memref<2xf32, #tpu.memory_space<smem>>
    %33 = vector.broadcast %32 : f32 to vector<4x256xf32>
    %34 = arith.addf %31, %33 : vector<4x256xf32>
    %cst_15 = arith.constant 0.000000e+00 : f32
    %35 = vector.broadcast %cst_15 : f32 to vector<4x256xf32>
    %c1 = arith.constant 1 : index
    %36 = memref.load %arg15[%c1] : memref<2xf32, #tpu.memory_space<smem>>
    %37 = vector.broadcast %36 : f32 to vector<4x256xf32>
    %38 = arith.addf %35, %37 : vector<4x256xf32>
    %c0_16 = arith.constant 0 : index
    %c0_17 = arith.constant 0 : index
    %39 = memref.load %arg12[%c0_16, %c0_17] : memref<2x8xf32, #tpu.memory_space<smem>>
    %40 = vector.broadcast %39 : f32 to vector<4x256xf32>
    %41 = arith.mulf %29, %40 : vector<4x256xf32>
    %c1_18 = arith.constant 1 : index
    %c0_19 = arith.constant 0 : index
    %42 = memref.load %arg12[%c1_18, %c0_19] : memref<2x8xf32, #tpu.memory_space<smem>>
    %43 = vector.broadcast %42 : f32 to vector<4x256xf32>
    %44 = arith.mulf %30, %43 : vector<4x256xf32>
    %45 = arith.addf %41, %44 : vector<4x256xf32>
    %c0_20 = arith.constant 0 : index
    %46 = memref.load %arg13[%c0_20] : memref<8xf32, #tpu.memory_space<smem>>
    %47 = vector.broadcast %46 : f32 to vector<4x256xf32>
    %48 = arith.addf %45, %47 : vector<4x256xf32>
    %cst_21 = arith.constant 5.000000e-01 : f32
    %49 = vector.broadcast %cst_21 : f32 to vector<4x256xf32>
    %50 = arith.mulf %49, %48 : vector<4x256xf32>
    %cst_22 = arith.constant 4.471500e-02 : f32
    %51 = vector.broadcast %cst_22 : f32 to vector<4x256xf32>
    %52 = arith.mulf %51, %48 : vector<4x256xf32>
    %53 = arith.mulf %52, %48 : vector<4x256xf32>
    %54 = arith.mulf %53, %48 : vector<4x256xf32>
    %55 = arith.addf %48, %54 : vector<4x256xf32>
    %cst_23 = arith.constant 0.797884583 : f32
    %56 = vector.broadcast %cst_23 : f32 to vector<4x256xf32>
    %57 = arith.mulf %56, %55 : vector<4x256xf32>
    %58 = math.tanh %57 : vector<4x256xf32>
    %cst_24 = arith.constant 1.000000e+00 : f32
    %59 = vector.broadcast %cst_24 : f32 to vector<4x256xf32>
    %60 = arith.addf %59, %58 : vector<4x256xf32>
    %61 = arith.mulf %50, %60 : vector<4x256xf32>
    %c0_25 = arith.constant 0 : index
    %c0_26 = arith.constant 0 : index
    %62 = memref.load %arg14[%c0_25, %c0_26] : memref<8x2xf32, #tpu.memory_space<smem>>
    %63 = vector.broadcast %62 : f32 to vector<4x256xf32>
    %64 = arith.mulf %61, %63 : vector<4x256xf32>
    %65 = arith.addf %34, %64 : vector<4x256xf32>
    %c0_27 = arith.constant 0 : index
    %c1_28 = arith.constant 1 : index
    %66 = memref.load %arg14[%c0_27, %c1_28] : memref<8x2xf32, #tpu.memory_space<smem>>
    %67 = vector.broadcast %66 : f32 to vector<4x256xf32>
    %68 = arith.mulf %61, %67 : vector<4x256xf32>
    %69 = arith.addf %38, %68 : vector<4x256xf32>
    %c0_29 = arith.constant 0 : index
    %c1_30 = arith.constant 1 : index
    %70 = memref.load %arg12[%c0_29, %c1_30] : memref<2x8xf32, #tpu.memory_space<smem>>
    %71 = vector.broadcast %70 : f32 to vector<4x256xf32>
    %72 = arith.mulf %29, %71 : vector<4x256xf32>
    %c1_31 = arith.constant 1 : index
    %c1_32 = arith.constant 1 : index
    %73 = memref.load %arg12[%c1_31, %c1_32] : memref<2x8xf32, #tpu.memory_space<smem>>
    %74 = vector.broadcast %73 : f32 to vector<4x256xf32>
    %75 = arith.mulf %30, %74 : vector<4x256xf32>
    %76 = arith.addf %72, %75 : vector<4x256xf32>
    %c1_33 = arith.constant 1 : index
    %77 = memref.load %arg13[%c1_33] : memref<8xf32, #tpu.memory_space<smem>>
    %78 = vector.broadcast %77 : f32 to vector<4x256xf32>
    %79 = arith.addf %76, %78 : vector<4x256xf32>
    %cst_34 = arith.constant 5.000000e-01 : f32
    %80 = vector.broadcast %cst_34 : f32 to vector<4x256xf32>
    %81 = arith.mulf %80, %79 : vector<4x256xf32>
    %cst_35 = arith.constant 4.471500e-02 : f32
    %82 = vector.broadcast %cst_35 : f32 to vector<4x256xf32>
    %83 = arith.mulf %82, %79 : vector<4x256xf32>
    %84 = arith.mulf %83, %79 : vector<4x256xf32>
    %85 = arith.mulf %84, %79 : vector<4x256xf32>
    %86 = arith.addf %79, %85 : vector<4x256xf32>
    %cst_36 = arith.constant 0.797884583 : f32
    %87 = vector.broadcast %cst_36 : f32 to vector<4x256xf32>
    %88 = arith.mulf %87, %86 : vector<4x256xf32>
    %89 = math.tanh %88 : vector<4x256xf32>
    %cst_37 = arith.constant 1.000000e+00 : f32
    %90 = vector.broadcast %cst_37 : f32 to vector<4x256xf32>
    %91 = arith.addf %90, %89 : vector<4x256xf32>
    %92 = arith.mulf %81, %91 : vector<4x256xf32>
    %c1_38 = arith.constant 1 : index
    %c0_39 = arith.constant 0 : index
    %93 = memref.load %arg14[%c1_38, %c0_39] : memref<8x2xf32, #tpu.memory_space<smem>>
    %94 = vector.broadcast %93 : f32 to vector<4x256xf32>
    %95 = arith.mulf %92, %94 : vector<4x256xf32>
    %96 = arith.addf %65, %95 : vector<4x256xf32>
    %c1_40 = arith.constant 1 : index
    %c1_41 = arith.constant 1 : index
    %97 = memref.load %arg14[%c1_40, %c1_41] : memref<8x2xf32, #tpu.memory_space<smem>>
    %98 = vector.broadcast %97 : f32 to vector<4x256xf32>
    %99 = arith.mulf %92, %98 : vector<4x256xf32>
    %100 = arith.addf %69, %99 : vector<4x256xf32>
    %c0_42 = arith.constant 0 : index
    %c2 = arith.constant 2 : index
    %101 = memref.load %arg12[%c0_42, %c2] : memref<2x8xf32, #tpu.memory_space<smem>>
    %102 = vector.broadcast %101 : f32 to vector<4x256xf32>
    %103 = arith.mulf %29, %102 : vector<4x256xf32>
    %c1_43 = arith.constant 1 : index
    %c2_44 = arith.constant 2 : index
    %104 = memref.load %arg12[%c1_43, %c2_44] : memref<2x8xf32, #tpu.memory_space<smem>>
    %105 = vector.broadcast %104 : f32 to vector<4x256xf32>
    %106 = arith.mulf %30, %105 : vector<4x256xf32>
    %107 = arith.addf %103, %106 : vector<4x256xf32>
    %c2_45 = arith.constant 2 : index
    %108 = memref.load %arg13[%c2_45] : memref<8xf32, #tpu.memory_space<smem>>
    %109 = vector.broadcast %108 : f32 to vector<4x256xf32>
    %110 = arith.addf %107, %109 : vector<4x256xf32>
    %cst_46 = arith.constant 5.000000e-01 : f32
    %111 = vector.broadcast %cst_46 : f32 to vector<4x256xf32>
    %112 = arith.mulf %111, %110 : vector<4x256xf32>
    %cst_47 = arith.constant 4.471500e-02 : f32
    %113 = vector.broadcast %cst_47 : f32 to vector<4x256xf32>
    %114 = arith.mulf %113, %110 : vector<4x256xf32>
    %115 = arith.mulf %114, %110 : vector<4x256xf32>
    %116 = arith.mulf %115, %110 : vector<4x256xf32>
    %117 = arith.addf %110, %116 : vector<4x256xf32>
    %cst_48 = arith.constant 0.797884583 : f32
    %118 = vector.broadcast %cst_48 : f32 to vector<4x256xf32>
    %119 = arith.mulf %118, %117 : vector<4x256xf32>
    %120 = math.tanh %119 : vector<4x256xf32>
    %cst_49 = arith.constant 1.000000e+00 : f32
    %121 = vector.broadcast %cst_49 : f32 to vector<4x256xf32>
    %122 = arith.addf %121, %120 : vector<4x256xf32>
    %123 = arith.mulf %112, %122 : vector<4x256xf32>
    %c2_50 = arith.constant 2 : index
    %c0_51 = arith.constant 0 : index
    %124 = memref.load %arg14[%c2_50, %c0_51] : memref<8x2xf32, #tpu.memory_space<smem>>
    %125 = vector.broadcast %124 : f32 to vector<4x256xf32>
    %126 = arith.mulf %123, %125 : vector<4x256xf32>
    %127 = arith.addf %96, %126 : vector<4x256xf32>
    %c2_52 = arith.constant 2 : index
    %c1_53 = arith.constant 1 : index
    %128 = memref.load %arg14[%c2_52, %c1_53] : memref<8x2xf32, #tpu.memory_space<smem>>
    %129 = vector.broadcast %128 : f32 to vector<4x256xf32>
    %130 = arith.mulf %123, %129 : vector<4x256xf32>
    %131 = arith.addf %100, %130 : vector<4x256xf32>
    %c0_54 = arith.constant 0 : index
    %c3 = arith.constant 3 : index
    %132 = memref.load %arg12[%c0_54, %c3] : memref<2x8xf32, #tpu.memory_space<smem>>
    %133 = vector.broadcast %132 : f32 to vector<4x256xf32>
    %134 = arith.mulf %29, %133 : vector<4x256xf32>
    %c1_55 = arith.constant 1 : index
    %c3_56 = arith.constant 3 : index
    %135 = memref.load %arg12[%c1_55, %c3_56] : memref<2x8xf32, #tpu.memory_space<smem>>
    %136 = vector.broadcast %135 : f32 to vector<4x256xf32>
    %137 = arith.mulf %30, %136 : vector<4x256xf32>
    %138 = arith.addf %134, %137 : vector<4x256xf32>
    %c3_57 = arith.constant 3 : index
    %139 = memref.load %arg13[%c3_57] : memref<8xf32, #tpu.memory_space<smem>>
    %140 = vector.broadcast %139 : f32 to vector<4x256xf32>
    %141 = arith.addf %138, %140 : vector<4x256xf32>
    %cst_58 = arith.constant 5.000000e-01 : f32
    %142 = vector.broadcast %cst_58 : f32 to vector<4x256xf32>
    %143 = arith.mulf %142, %141 : vector<4x256xf32>
    %cst_59 = arith.constant 4.471500e-02 : f32
    %144 = vector.broadcast %cst_59 : f32 to vector<4x256xf32>
    %145 = arith.mulf %144, %141 : vector<4x256xf32>
    %146 = arith.mulf %145, %141 : vector<4x256xf32>
    %147 = arith.mulf %146, %141 : vector<4x256xf32>
    %148 = arith.addf %141, %147 : vector<4x256xf32>
    %cst_60 = arith.constant 0.797884583 : f32
    %149 = vector.broadcast %cst_60 : f32 to vector<4x256xf32>
    %150 = arith.mulf %149, %148 : vector<4x256xf32>
    %151 = math.tanh %150 : vector<4x256xf32>
    %cst_61 = arith.constant 1.000000e+00 : f32
    %152 = vector.broadcast %cst_61 : f32 to vector<4x256xf32>
    %153 = arith.addf %152, %151 : vector<4x256xf32>
    %154 = arith.mulf %143, %153 : vector<4x256xf32>
    %c3_62 = arith.constant 3 : index
    %c0_63 = arith.constant 0 : index
    %155 = memref.load %arg14[%c3_62, %c0_63] : memref<8x2xf32, #tpu.memory_space<smem>>
    %156 = vector.broadcast %155 : f32 to vector<4x256xf32>
    %157 = arith.mulf %154, %156 : vector<4x256xf32>
    %158 = arith.addf %127, %157 : vector<4x256xf32>
    %c3_64 = arith.constant 3 : index
    %c1_65 = arith.constant 1 : index
    %159 = memref.load %arg14[%c3_64, %c1_65] : memref<8x2xf32, #tpu.memory_space<smem>>
    %160 = vector.broadcast %159 : f32 to vector<4x256xf32>
    %161 = arith.mulf %154, %160 : vector<4x256xf32>
    %162 = arith.addf %131, %161 : vector<4x256xf32>
    %c0_66 = arith.constant 0 : index
    %c4 = arith.constant 4 : index
    %163 = memref.load %arg12[%c0_66, %c4] : memref<2x8xf32, #tpu.memory_space<smem>>
    %164 = vector.broadcast %163 : f32 to vector<4x256xf32>
    %165 = arith.mulf %29, %164 : vector<4x256xf32>
    %c1_67 = arith.constant 1 : index
    %c4_68 = arith.constant 4 : index
    %166 = memref.load %arg12[%c1_67, %c4_68] : memref<2x8xf32, #tpu.memory_space<smem>>
    %167 = vector.broadcast %166 : f32 to vector<4x256xf32>
    %168 = arith.mulf %30, %167 : vector<4x256xf32>
    %169 = arith.addf %165, %168 : vector<4x256xf32>
    %c4_69 = arith.constant 4 : index
    %170 = memref.load %arg13[%c4_69] : memref<8xf32, #tpu.memory_space<smem>>
    %171 = vector.broadcast %170 : f32 to vector<4x256xf32>
    %172 = arith.addf %169, %171 : vector<4x256xf32>
    %cst_70 = arith.constant 5.000000e-01 : f32
    %173 = vector.broadcast %cst_70 : f32 to vector<4x256xf32>
    %174 = arith.mulf %173, %172 : vector<4x256xf32>
    %cst_71 = arith.constant 4.471500e-02 : f32
    %175 = vector.broadcast %cst_71 : f32 to vector<4x256xf32>
    %176 = arith.mulf %175, %172 : vector<4x256xf32>
    %177 = arith.mulf %176, %172 : vector<4x256xf32>
    %178 = arith.mulf %177, %172 : vector<4x256xf32>
    %179 = arith.addf %172, %178 : vector<4x256xf32>
    %cst_72 = arith.constant 0.797884583 : f32
    %180 = vector.broadcast %cst_72 : f32 to vector<4x256xf32>
    %181 = arith.mulf %180, %179 : vector<4x256xf32>
    %182 = math.tanh %181 : vector<4x256xf32>
    %cst_73 = arith.constant 1.000000e+00 : f32
    %183 = vector.broadcast %cst_73 : f32 to vector<4x256xf32>
    %184 = arith.addf %183, %182 : vector<4x256xf32>
    %185 = arith.mulf %174, %184 : vector<4x256xf32>
    %c4_74 = arith.constant 4 : index
    %c0_75 = arith.constant 0 : index
    %186 = memref.load %arg14[%c4_74, %c0_75] : memref<8x2xf32, #tpu.memory_space<smem>>
    %187 = vector.broadcast %186 : f32 to vector<4x256xf32>
    %188 = arith.mulf %185, %187 : vector<4x256xf32>
    %189 = arith.addf %158, %188 : vector<4x256xf32>
    %c4_76 = arith.constant 4 : index
    %c1_77 = arith.constant 1 : index
    %190 = memref.load %arg14[%c4_76, %c1_77] : memref<8x2xf32, #tpu.memory_space<smem>>
    %191 = vector.broadcast %190 : f32 to vector<4x256xf32>
    %192 = arith.mulf %185, %191 : vector<4x256xf32>
    %193 = arith.addf %162, %192 : vector<4x256xf32>
    %c0_78 = arith.constant 0 : index
    %c5 = arith.constant 5 : index
    %194 = memref.load %arg12[%c0_78, %c5] : memref<2x8xf32, #tpu.memory_space<smem>>
    %195 = vector.broadcast %194 : f32 to vector<4x256xf32>
    %196 = arith.mulf %29, %195 : vector<4x256xf32>
    %c1_79 = arith.constant 1 : index
    %c5_80 = arith.constant 5 : index
    %197 = memref.load %arg12[%c1_79, %c5_80] : memref<2x8xf32, #tpu.memory_space<smem>>
    %198 = vector.broadcast %197 : f32 to vector<4x256xf32>
    %199 = arith.mulf %30, %198 : vector<4x256xf32>
    %200 = arith.addf %196, %199 : vector<4x256xf32>
    %c5_81 = arith.constant 5 : index
    %201 = memref.load %arg13[%c5_81] : memref<8xf32, #tpu.memory_space<smem>>
    %202 = vector.broadcast %201 : f32 to vector<4x256xf32>
    %203 = arith.addf %200, %202 : vector<4x256xf32>
    %cst_82 = arith.constant 5.000000e-01 : f32
    %204 = vector.broadcast %cst_82 : f32 to vector<4x256xf32>
    %205 = arith.mulf %204, %203 : vector<4x256xf32>
    %cst_83 = arith.constant 4.471500e-02 : f32
    %206 = vector.broadcast %cst_83 : f32 to vector<4x256xf32>
    %207 = arith.mulf %206, %203 : vector<4x256xf32>
    %208 = arith.mulf %207, %203 : vector<4x256xf32>
    %209 = arith.mulf %208, %203 : vector<4x256xf32>
    %210 = arith.addf %203, %209 : vector<4x256xf32>
    %cst_84 = arith.constant 0.797884583 : f32
    %211 = vector.broadcast %cst_84 : f32 to vector<4x256xf32>
    %212 = arith.mulf %211, %210 : vector<4x256xf32>
    %213 = math.tanh %212 : vector<4x256xf32>
    %cst_85 = arith.constant 1.000000e+00 : f32
    %214 = vector.broadcast %cst_85 : f32 to vector<4x256xf32>
    %215 = arith.addf %214, %213 : vector<4x256xf32>
    %216 = arith.mulf %205, %215 : vector<4x256xf32>
    %c5_86 = arith.constant 5 : index
    %c0_87 = arith.constant 0 : index
    %217 = memref.load %arg14[%c5_86, %c0_87] : memref<8x2xf32, #tpu.memory_space<smem>>
    %218 = vector.broadcast %217 : f32 to vector<4x256xf32>
    %219 = arith.mulf %216, %218 : vector<4x256xf32>
    %220 = arith.addf %189, %219 : vector<4x256xf32>
    %c5_88 = arith.constant 5 : index
    %c1_89 = arith.constant 1 : index
    %221 = memref.load %arg14[%c5_88, %c1_89] : memref<8x2xf32, #tpu.memory_space<smem>>
    %222 = vector.broadcast %221 : f32 to vector<4x256xf32>
    %223 = arith.mulf %216, %222 : vector<4x256xf32>
    %224 = arith.addf %193, %223 : vector<4x256xf32>
    %c0_90 = arith.constant 0 : index
    %c6 = arith.constant 6 : index
    %225 = memref.load %arg12[%c0_90, %c6] : memref<2x8xf32, #tpu.memory_space<smem>>
    %226 = vector.broadcast %225 : f32 to vector<4x256xf32>
    %227 = arith.mulf %29, %226 : vector<4x256xf32>
    %c1_91 = arith.constant 1 : index
    %c6_92 = arith.constant 6 : index
    %228 = memref.load %arg12[%c1_91, %c6_92] : memref<2x8xf32, #tpu.memory_space<smem>>
    %229 = vector.broadcast %228 : f32 to vector<4x256xf32>
    %230 = arith.mulf %30, %229 : vector<4x256xf32>
    %231 = arith.addf %227, %230 : vector<4x256xf32>
    %c6_93 = arith.constant 6 : index
    %232 = memref.load %arg13[%c6_93] : memref<8xf32, #tpu.memory_space<smem>>
    %233 = vector.broadcast %232 : f32 to vector<4x256xf32>
    %234 = arith.addf %231, %233 : vector<4x256xf32>
    %cst_94 = arith.constant 5.000000e-01 : f32
    %235 = vector.broadcast %cst_94 : f32 to vector<4x256xf32>
    %236 = arith.mulf %235, %234 : vector<4x256xf32>
    %cst_95 = arith.constant 4.471500e-02 : f32
    %237 = vector.broadcast %cst_95 : f32 to vector<4x256xf32>
    %238 = arith.mulf %237, %234 : vector<4x256xf32>
    %239 = arith.mulf %238, %234 : vector<4x256xf32>
    %240 = arith.mulf %239, %234 : vector<4x256xf32>
    %241 = arith.addf %234, %240 : vector<4x256xf32>
    %cst_96 = arith.constant 0.797884583 : f32
    %242 = vector.broadcast %cst_96 : f32 to vector<4x256xf32>
    %243 = arith.mulf %242, %241 : vector<4x256xf32>
    %244 = math.tanh %243 : vector<4x256xf32>
    %cst_97 = arith.constant 1.000000e+00 : f32
    %245 = vector.broadcast %cst_97 : f32 to vector<4x256xf32>
    %246 = arith.addf %245, %244 : vector<4x256xf32>
    %247 = arith.mulf %236, %246 : vector<4x256xf32>
    %c6_98 = arith.constant 6 : index
    %c0_99 = arith.constant 0 : index
    %248 = memref.load %arg14[%c6_98, %c0_99] : memref<8x2xf32, #tpu.memory_space<smem>>
    %249 = vector.broadcast %248 : f32 to vector<4x256xf32>
    %250 = arith.mulf %247, %249 : vector<4x256xf32>
    %251 = arith.addf %220, %250 : vector<4x256xf32>
    %c6_100 = arith.constant 6 : index
    %c1_101 = arith.constant 1 : index
    %252 = memref.load %arg14[%c6_100, %c1_101] : memref<8x2xf32, #tpu.memory_space<smem>>
    %253 = vector.broadcast %252 : f32 to vector<4x256xf32>
    %254 = arith.mulf %247, %253 : vector<4x256xf32>
    %255 = arith.addf %224, %254 : vector<4x256xf32>
    %c0_102 = arith.constant 0 : index
    %c7 = arith.constant 7 : index
    %256 = memref.load %arg12[%c0_102, %c7] : memref<2x8xf32, #tpu.memory_space<smem>>
    %257 = vector.broadcast %256 : f32 to vector<4x256xf32>
    %258 = arith.mulf %29, %257 : vector<4x256xf32>
    %c1_103 = arith.constant 1 : index
    %c7_104 = arith.constant 7 : index
    %259 = memref.load %arg12[%c1_103, %c7_104] : memref<2x8xf32, #tpu.memory_space<smem>>
    %260 = vector.broadcast %259 : f32 to vector<4x256xf32>
    %261 = arith.mulf %30, %260 : vector<4x256xf32>
    %262 = arith.addf %258, %261 : vector<4x256xf32>
    %c7_105 = arith.constant 7 : index
    %263 = memref.load %arg13[%c7_105] : memref<8xf32, #tpu.memory_space<smem>>
    %264 = vector.broadcast %263 : f32 to vector<4x256xf32>
    %265 = arith.addf %262, %264 : vector<4x256xf32>
    %cst_106 = arith.constant 5.000000e-01 : f32
    %266 = vector.broadcast %cst_106 : f32 to vector<4x256xf32>
    %267 = arith.mulf %266, %265 : vector<4x256xf32>
    %cst_107 = arith.constant 4.471500e-02 : f32
    %268 = vector.broadcast %cst_107 : f32 to vector<4x256xf32>
    %269 = arith.mulf %268, %265 : vector<4x256xf32>
    %270 = arith.mulf %269, %265 : vector<4x256xf32>
    %271 = arith.mulf %270, %265 : vector<4x256xf32>
    %272 = arith.addf %265, %271 : vector<4x256xf32>
    %cst_108 = arith.constant 0.797884583 : f32
    %273 = vector.broadcast %cst_108 : f32 to vector<4x256xf32>
    %274 = arith.mulf %273, %272 : vector<4x256xf32>
    %275 = math.tanh %274 : vector<4x256xf32>
    %cst_109 = arith.constant 1.000000e+00 : f32
    %276 = vector.broadcast %cst_109 : f32 to vector<4x256xf32>
    %277 = arith.addf %276, %275 : vector<4x256xf32>
    %278 = arith.mulf %267, %277 : vector<4x256xf32>
    %c7_110 = arith.constant 7 : index
    %c0_111 = arith.constant 0 : index
    %279 = memref.load %arg14[%c7_110, %c0_111] : memref<8x2xf32, #tpu.memory_space<smem>>
    %280 = vector.broadcast %279 : f32 to vector<4x256xf32>
    %281 = arith.mulf %278, %280 : vector<4x256xf32>
    %282 = arith.addf %251, %281 : vector<4x256xf32>
    %c7_112 = arith.constant 7 : index
    %c1_113 = arith.constant 1 : index
    %283 = memref.load %arg14[%c7_112, %c1_113] : memref<8x2xf32, #tpu.memory_space<smem>>
    %284 = vector.broadcast %283 : f32 to vector<4x256xf32>
    %285 = arith.mulf %278, %284 : vector<4x256xf32>
    %286 = arith.addf %255, %285 : vector<4x256xf32>
    %287 = tpu.concatenate %282, %286 in 1 : vector<4x256xf32>, vector<4x256xf32> -> vector<4x512xf32>
    %288 = arith.truncf %287 : vector<4x512xf32> to vector<4x512xbf16>
    %c0_114 = arith.constant 0 : index
    %c0_115 = arith.constant 0 : index
    %289 = vector.load %arg7[%c0_114, %c0_115] : memref<512x256xbf16, #tpu.memory_space<vmem>>, vector<512x256xbf16>
    %cst_116 = arith.constant dense<0.000000e+00> : vector<4x256xf32>
    %290 = tpu.matmul %288, %289, %cst_116 {dimension_numbers = #tpu.dot_dimension_numbers<[1], [0], [0], [1], [0, 0, 1, 1], [], []>} : vector<4x512xbf16>, vector<512x256xbf16>, vector<4x256xf32> -> vector<4x256xf32>
    %291 = arith.addf %290, %1 : vector<4x256xf32>
    %cst_117 = arith.constant dense<0.000000e+00> : vector<256xf32>
    %292 = vector.multi_reduction <add>, %291, %cst_117 [0] : vector<4x256xf32> to vector<256xf32>
    %293 = vector.shape_cast %292 : vector<256xf32> to vector<1x256xf32>
    %cst_118 = arith.constant 4.000000e+00 : f32
    %294 = vector.broadcast %cst_118 : f32 to vector<1x256xf32>
    %295 = arith.divf %293, %294 : vector<1x256xf32>
    %296 = vector.broadcast %295 : vector<1x256xf32> to vector<4x256xf32>
    %297 = arith.subf %291, %296 : vector<4x256xf32>
    %298 = arith.mulf %297, %297 : vector<4x256xf32>
    %cst_119 = arith.constant dense<0.000000e+00> : vector<256xf32>
    %299 = vector.multi_reduction <add>, %298, %cst_119 [0] : vector<4x256xf32> to vector<256xf32>
    %300 = vector.shape_cast %299 : vector<256xf32> to vector<1x256xf32>
    %cst_120 = arith.constant 4.000000e+00 : f32
    %301 = vector.broadcast %cst_120 : f32 to vector<1x256xf32>
    %302 = arith.divf %300, %301 : vector<1x256xf32>
    %303 = vector.broadcast %295 : vector<1x256xf32> to vector<4x256xf32>
    %304 = arith.subf %291, %303 : vector<4x256xf32>
    %cst_121 = arith.constant 9.99999974E-6 : f32
    %305 = vector.broadcast %cst_121 : f32 to vector<1x256xf32>
    %306 = arith.addf %302, %305 : vector<1x256xf32>
    %307 = math.rsqrt %306 : vector<1x256xf32>
    %308 = vector.broadcast %307 : vector<1x256xf32> to vector<4x256xf32>
    %309 = arith.mulf %304, %308 : vector<4x256xf32>
    %c0_122 = arith.constant 0 : index
    %c0_123 = arith.constant 0 : index
    %310 = vector.load %arg4[%c0_122, %c0_123] : memref<4x1xf32, #tpu.memory_space<vmem>>, vector<4x1xf32>
    %311 = vector.broadcast %310 : vector<4x1xf32> to vector<4x256xf32>
    %312 = arith.mulf %309, %311 : vector<4x256xf32>
    %c0_124 = arith.constant 0 : index
    %c0_125 = arith.constant 0 : index
    %313 = vector.load %arg5[%c0_124, %c0_125] : memref<4x1xf32, #tpu.memory_space<vmem>>, vector<4x1xf32>
    %314 = vector.broadcast %313 : vector<4x1xf32> to vector<4x256xf32>
    %315 = arith.addf %312, %314 : vector<4x256xf32>
    %c0_126 = arith.constant 0 : index
    %c0_127 = arith.constant 0 : index
    %316 = vector.load %arg8[%c0_126, %c0_127] : memref<8x4xbf16, #tpu.memory_space<vmem>>, vector<8x4xbf16>
    %317 = arith.truncf %315 : vector<4x256xf32> to vector<4x256xbf16>
    %cst_128 = arith.constant dense<0.000000e+00> : vector<8x256xf32>
    %318 = tpu.matmul %316, %317, %cst_128 {dimension_numbers = #tpu.dot_dimension_numbers<[1], [0], [0], [1], [0, 0, 1, 1], [], []>} : vector<8x4xbf16>, vector<4x256xbf16>, vector<8x256xf32> -> vector<8x256xf32>
    %c0_129 = arith.constant 0 : index
    %c0_130 = arith.constant 0 : index
    %319 = vector.load %arg9[%c0_129, %c0_130] : memref<8x1xf32, #tpu.memory_space<vmem>>, vector<8x1xf32>
    %320 = vector.broadcast %319 : vector<8x1xf32> to vector<8x256xf32>
    %321 = arith.addf %318, %320 : vector<8x256xf32>
    %cst_131 = arith.constant 5.000000e-01 : f32
    %322 = vector.broadcast %cst_131 : f32 to vector<8x256xf32>
    %323 = arith.mulf %322, %321 : vector<8x256xf32>
    %cst_132 = arith.constant 4.471500e-02 : f32
    %324 = vector.broadcast %cst_132 : f32 to vector<8x256xf32>
    %325 = arith.mulf %324, %321 : vector<8x256xf32>
    %326 = arith.mulf %325, %321 : vector<8x256xf32>
    %327 = arith.mulf %326, %321 : vector<8x256xf32>
    %328 = arith.addf %321, %327 : vector<8x256xf32>
    %cst_133 = arith.constant 0.797884583 : f32
    %329 = vector.broadcast %cst_133 : f32 to vector<8x256xf32>
    %330 = arith.mulf %329, %328 : vector<8x256xf32>
    %331 = math.tanh %330 : vector<8x256xf32>
    %cst_134 = arith.constant 1.000000e+00 : f32
    %332 = vector.broadcast %cst_134 : f32 to vector<8x256xf32>
    %333 = arith.addf %332, %331 : vector<8x256xf32>
    %334 = arith.mulf %323, %333 : vector<8x256xf32>
    %c0_135 = arith.constant 0 : index
    %c0_136 = arith.constant 0 : index
    %335 = vector.load %arg10[%c0_135, %c0_136] : memref<4x8xbf16, #tpu.memory_space<vmem>>, vector<4x8xbf16>
    %336 = arith.truncf %334 : vector<8x256xf32> to vector<8x256xbf16>
    %cst_137 = arith.constant dense<0.000000e+00> : vector<4x256xf32>
    %337 = tpu.matmul %335, %336, %cst_137 {dimension_numbers = #tpu.dot_dimension_numbers<[1], [0], [0], [1], [0, 0, 1, 1], [], []>} : vector<4x8xbf16>, vector<8x256xbf16>, vector<4x256xf32> -> vector<4x256xf32>
    %c0_138 = arith.constant 0 : index
    %c0_139 = arith.constant 0 : index
    %338 = vector.load %arg11[%c0_138, %c0_139] : memref<4x1xf32, #tpu.memory_space<vmem>>, vector<4x1xf32>
    %339 = vector.broadcast %338 : vector<4x1xf32> to vector<4x256xf32>
    %340 = arith.addf %337, %339 : vector<4x256xf32>
    %341 = arith.addf %340, %291 : vector<4x256xf32>
    %c0_140 = arith.constant 0 : index
    %c0_141 = arith.constant 0 : index
    %c0_142 = arith.constant 0 : index
    %342 = vector.load %arg16[%c0_140, %c0_141, %c0_142] : memref<1x4x256xf32, #tpu.memory_space<vmem>>, vector<1x4x256xf32>
    %343 = vector.shape_cast %342 : vector<1x4x256xf32> to vector<4x256xf32>
    %344 = vector.shape_cast %341 : vector<4x256xf32> to vector<1x4x256xf32>
    tpu.vector_store %arg16[%c0_140, %c0_141, %c0_142], %344 {strides = array<i32>} : memref<1x4x256xf32, #tpu.memory_space<vmem>>, vector<1x4x256xf32>,
    return
  }
  func.func @transform_0(%arg0: i32) -> (i32, i32, i32) {
    %c0_i32 = arith.constant 0 : i32
    %c0_i32_0 = arith.constant 0 : i32
    %c0_i32_1 = arith.constant 0 : i32
    return %arg0, %c0_i32, %c0_i32_0 : i32, i32, i32
  }
  func.func @transform_1(%arg0: i32) -> (i32, i32) {
    %c0_i32 = arith.constant 0 : i32
    %c0_i32_0 = arith.constant 0 : i32
    %c0_i32_1 = arith.constant 0 : i32
    return %c0_i32, %c0_i32_0 : i32, i32
  }
  func.func @transform_2(%arg0: i32) -> (i32, i32) {
    %c0_i32 = arith.constant 0 : i32
    %c0_i32_0 = arith.constant 0 : i32
    %c0_i32_1 = arith.constant 0 : i32
    return %c0_i32, %c0_i32_0 : i32, i32
  }
  func.func @transform_3(%arg0: i32) -> (i32, i32) {
    %c0_i32 = arith.constant 0 : i32
    %c0_i32_0 = arith.constant 0 : i32
    %c0_i32_1 = arith.constant 0 : i32
    return %c0_i32, %c0_i32_0 : i32, i32
  }
  func.func @transform_4(%arg0: i32) -> (i32, i32) {
    %c0_i32 = arith.constant 0 : i32
    %c0_i32_0 = arith.constant 0 : i32
    %c0_i32_1 = arith.constant 0 : i32
    return %c0_i32, %c0_i32_0 : i32, i32
  }
  func.func @transform_5(%arg0: i32) -> (i32, i32) {
    %c0_i32 = arith.constant 0 : i32
    %c0_i32_0 = arith.constant 0 : i32
    %c0_i32_1 = arith.constant 0 : i32
    return %c0_i32, %c0_i32_0 : i32, i32
  }
  func.func @transform_6(%arg0: i32) -> (i32, i32) {
    %c0_i32 = arith.constant 0 : i32
    %c0_i32_0 = arith.constant 0 : i32
    %c0_i32_1 = arith.constant 0 : i32
    return %c0_i32, %c0_i32_0 : i32, i32
  }
  func.func @transform_7(%arg0: i32) -> (i32, i32) {
    %c0_i32 = arith.constant 0 : i32
    %c0_i32_0 = arith.constant 0 : i32
    %c0_i32_1 = arith.constant 0 : i32
    return %c0_i32, %c0_i32_0 : i32, i32
  }
  func.func @transform_8(%arg0: i32) -> (i32, i32) {
    %c0_i32 = arith.constant 0 : i32
    %c0_i32_0 = arith.constant 0 : i32
    %c0_i32_1 = arith.constant 0 : i32
    return %c0_i32, %c0_i32_0 : i32, i32
  }
  func.func @transform_9(%arg0: i32) -> (i32, i32) {
    %c0_i32 = arith.constant 0 : i32
    %c0_i32_0 = arith.constant 0 : i32
    %c0_i32_1 = arith.constant 0 : i32
    return %c0_i32, %c0_i32_0 : i32, i32
  }
  func.func @transform_10(%arg0: i32) -> (i32, i32) {
    %c0_i32 = arith.constant 0 : i32
    %c0_i32_0 = arith.constant 0 : i32
    %c0_i32_1 = arith.constant 0 : i32
    return %c0_i32, %c0_i32_0 : i32, i32
  }
  func.func @transform_11(%arg0: i32) -> (i32, i32) {
    %c0_i32 = arith.constant 0 : i32
    %c0_i32_0 = arith.constant 0 : i32
    %c0_i32_1 = arith.constant 0 : i32
    return %c0_i32, %c0_i32_0 : i32, i32
  }
  func.func @transform_12(%arg0: i32) -> i32 {
    %c0_i32 = arith.constant 0 : i32
    %c0_i32_0 = arith.constant 0 : i32
    return %c0_i32 : i32
  }
  func.func @transform_13(%arg0: i32) -> (i32, i32) {
    %c0_i32 = arith.constant 0 : i32
    %c0_i32_0 = arith.constant 0 : i32
    %c0_i32_1 = arith.constant 0 : i32
    return %c0_i32, %c0_i32_0 : i32, i32
  }
  func.func @transform_14(%arg0: i32) -> i32 {
    %c0_i32 = arith.constant 0 : i32
    %c0_i32_0 = arith.constant 0 : i32
    return %c0_i32 : i32
  }
  func.func @transform_15(%arg0: i32) -> (i32, i32, i32) {
    %c0_i32 = arith.constant 0 : i32
    %c0_i32_0 = arith.constant 0 : i32
    %c0_i32_1 = arith.constant 0 : i32
    return %arg0, %c0_i32, %c0_i32_0 : i32, i32, i32
  }
}

</mosaic_0001>

<bundles_post_ra>
// kernel: afno_transformer_block.1
= control target key start
LH: loop header
LB: loop body
LE: loop exit
PB: predicated region body
PF: predicated region fallthrough
CT: control target
= control target key end

     0   :  { %s3645_s0 = inlined_call_operand.vmem [shape: f32[2,4,256], index: 0, kind: input, shape index: {}]   ;;  %s3646_s1 = inlined_call_operand.vmem [shape: f32[4,1], index: 1, kind: input, shape index: {}]   ;;  %s3647_s2 = inlined_call_operand.vmem [shape: f32[4,1], index: 2, kind: input, shape index: {}]   ;;  %s3648_s3 = inlined_call_operand.vmem [shape: f32[4,1], index: 3, kind: input, shape index: {}]   ;;  %s3649_s4 = inlined_call_operand.vmem [shape: f32[4,1], index: 4, kind: input, shape index: {}]   ;;  %s3650_s5 = inlined_call_operand.hbm [shape: bf16[256,512], index: 5, kind: input, shape index: {}]   ;;  %s3651_s6 = inlined_call_operand.hbm [shape: bf16[512,256], index: 6, kind: input, shape index: {}]   ;;  %s3652_s7 = inlined_call_operand.vmem [shape: bf16[8,4], index: 7, kind: input, shape index: {}]   ;;  %s3653_s8 = inlined_call_operand.vmem [shape: f32[8,1], index: 8, kind: input, shape index: {}]   ;;  %s3654_s9 = inlined_call_operand.vmem [shape: bf16[4,8], index: 9, kind: input, shape index: {}]   ;;  %s3655_s10 = inlined_call_operand.vmem [shape: f32[4,1], index: 10, kind: input, shape index: {}]   ;;  %s3656_s11 = inlined_call_operand.vmem [shape: f32[2,8], index: 11, kind: input, shape index: {}]   ;;  %s3657_s12 = inlined_call_operand.vmem [shape: f32[8], index: 12, kind: input, shape index: {}]   ;;  %s3658_s13 = inlined_call_operand.vmem [shape: f32[8,2], index: 13, kind: input, shape index: {}]   ;;  %s3659_s14 = inlined_call_operand.vmem [shape: f32[2], index: 14, kind: input, shape index: {}]   ;;  %s3660_s15 = inlined_call_operand.vmem [shape: f32[2,4,256], index: 15, kind: output, shape index: {}]  }
   0x1   :  { %3668 = sst [smem:[#allocation22_spill]] %s3645_s0 }
   0x2   :  { %3669 = sst [smem:[#allocation23_spill]] %s3646_s1 }
   0x3   :  { %3670 = sst [smem:[#allocation24_spill]] %s3647_s2 }
   0x4   :  { %3671 = sst [smem:[#allocation25_spill]] %s3648_s3 }
   0x5   :  { %3672 = sst [smem:[#allocation26_spill]] %s3649_s4 }
   0x6   :  { %3673 = sst [smem:[#allocation27_spill]] %s3650_s5 }
   0x7   :  { %3674 = sst [smem:[#allocation28_spill]] %s3651_s6 }
   0x8   :  { %3675 = sst [smem:[#allocation29_spill]] %s3652_s7 }
   0x9   :  { %3676 = sst [smem:[#allocation30_spill]] %s3653_s8 }
   0xa   :  { %3677 = sst [smem:[#allocation31_spill]] %s3654_s9 }
   0xb   :  { %3678 = sst [smem:[#allocation32_spill]] %s3655_s10 }
   0xc   :  { %3679 = sst [smem:[#allocation33_spill]] %s3656_s11 }
   0xd   :  { %3680 = sst [smem:[#allocation34_spill]] %s3657_s12 }
   0xe   :  { %3681 = sst [smem:[#allocation35_spill]] %s3658_s13 }
   0xf   :  { %3682 = sst [smem:[#allocation36_spill]] %s3659_s14 }
  0x10   :  { %3683 = sst [smem:[#allocation37_spill]] %s3660_s15 }
  0x11   :  { %20 = vsyncpa [#allocation3], 0 }
  0x12   :  { %21 = vsyncpa [#allocation6], 0 }
  0x13   :  { %22 = vsyncpa [#allocation4], 0 }
  0x14   :  { %23 = vsyncpa [#allocation9], 0 }
  0x15   :  { %24 = vsyncpa [#allocation12], 0  ;;  %s3035_s18 = smov 0  }
  0x16 LB: > { %3684 = sst [smem:[#allocation18_spill]] %s2941_s18  ;;  %s3685_s12 = sld [smem:[#allocation34_spill]]  ;;  %s2941_s18 = sphi %s3035_s18, %s30_s18  }
  0x17   : > { %s3044_s22 = sadd.s32 4294967295, %s2941_s18   ;;  %p2285_p0 = scmp.ge.s32.totalorder %s2941_s18, 1 }
  0x18   : > { %p381_p1 = scmp.lt.s32.totalorder %s2941_s18, 3  ;;  %p3662_p2 = scmp.eq.s32.totalorder %s3044_s22, 0 }
  0x19   : > { %s2943_s24 = smov [#allocation2]   ;;  %s2944_s27 = smov [#allocation5]  }
  0x1a   : > { %p3049_p3 = pnand %p2285_p0, %p381_p1  ;;  %s405_s25 = sshll.u32 %s2943_s24, 4  ;;  %s3055_s25 = int_to_ptr.vmem [resolvable:$true] %s405_s25 }
  0x1b   : > { %s418_s28 = sshll.u32 %s2944_s27, 4  ;;  %s3063_s28 = int_to_ptr.vmem [resolvable:$true] %s418_s28 }
  0x1c   : > { %s455_s21 = sshll.u32 %s3685_s12, 4  ;;  %p2508_p4 = pneg %p3049_p3  ;;  %s456_s21 = int_to_ptr.vmem [resolvable:$true] %s455_s21 }
  0x1d   : > { %s3686_s23 = scalar_select %p3049_p3, 1, 0 }
  0x1e   : > { %p3059_p5 = pnand %p3662_p2, %p2508_p4  ;;  %s2799_s29 = scalar_lea.vmem %s456_s21, 16 }
  0x1f   : > { %p2800_p6 = scmp.ne.s32.totalorder %s456_s21, %s2799_s29  ;;  %p2807_p10 = scmp.lt.s32.totalorder %s456_s21, %s456_s21 }
  0x20   : > { %p3067_p7 = pneg %p3059_p5  ;;  %p2808_p11 = scmp.lt.s32.totalorder %s2799_s29, %s2799_s29 }
  0x22   : > { %p2802_p8 = pnand %p3067_p7, %p2800_p6  ;;  %p2809_p12 = por %p2808_p11, %p2807_p10 }
  0x24   : > { %p2803_p9 = pneg %p2802_p8 }
  0x26   : > { %p2810_p13 = pnand %p2809_p12, %p2803_p9 }
  0x28   : > { %2813 = shalt.err (!%p2810_p13)
}
  0x29   : > { %s2945_s16 = smov [#allocation8]   ;;  %s3689_s5 = sld [smem:[#allocation27_spill]] }
  0x2a   : > { %2520 = dma.vmem_to_smem (!%p3059_p5), %s456_s21, 16, %s2945_s16, [#allocation9]  }
  0x2f   : > { %s2814_s20 = scalar_lea.hbm %s3689_s5, 8192 }
  0x30   : > { %p2815_p0 = scmp.ne.s32.totalorder %s3689_s5, %s2814_s20  ;;  %p2821_p6 = scmp.lt.u32.totalorder %s2814_s20, %s3689_s5 }
  0x32   : > { %p2817_p1 = pnand %p2815_p0, %p3067_p7 }
  0x34   : > { %p2818_p4 = pneg %p2817_p1 }
  0x36   : > { %p2823_p8 = pnand %p2821_p6, %p2818_p4 }
  0x38   : > { %2826 = shalt.err (!%p2823_p8)
}
  0x39   : > { %s2827_s21 = scalar_lea.vmem %s3055_s25, 8192  ;;  %p2835_p12 = scmp.lt.s32.totalorder %s3055_s25, %s3055_s25 }
  0x3a   : > { %p2828_p9 = scmp.ne.s32.totalorder %s3055_s25, %s2827_s21  ;;  %p2836_p13 = scmp.lt.s32.totalorder %s2827_s21, %s2827_s21 }
  0x3c   : > { %p2830_p10 = pnand %p2828_p9, %p3067_p7  ;;  %p2837_p0 = por %p2836_p13, %p2835_p12 }
  0x3e   : > { %p2831_p11 = pneg %p2830_p10 }
  0x40   : > { %p2838_p1 = pnand %p2837_p0, %p2831_p11 }
  0x42   : > { %2841 = shalt.err (!%p2838_p1)
}
  0x43   : > { %s2946_s16 = smov 256   ;;  %s2947_s12 = smov 16  }
  0x44   : > { %2511 = dma.hbm_to_vmem [thread:$0]  (!%p3059_p5), %s3689_s5, 8192, %s3055_s25, [#allocation3], %s2946_s16, %s2946_s16, %s2947_s12  }
  0x45   : > { %s3690_s6 = sld [smem:[#allocation28_spill]] }
  0x4b   : > { %s2842_s27 = scalar_lea.hbm %s3690_s6, 8192 }
  0x4c   : > { %p2843_p4 = scmp.ne.s32.totalorder %s3690_s6, %s2842_s27  ;;  %p2849_p9 = scmp.lt.u32.totalorder %s2842_s27, %s3690_s6 }
  0x4e   : > { %p2845_p6 = pnand %p2843_p4, %p3067_p7 }
  0x50   : > { %p2846_p8 = pneg %p2845_p6 }
  0x52   : > { %p2851_p10 = pnand %p2849_p9, %p2846_p8 }
  0x54   : > { %2854 = shalt.err (!%p2851_p10)
}
  0x55   : > { %s2855_s25 = scalar_lea.vmem %s3063_s28, 8192  ;;  %p2863_p0 = scmp.lt.s32.totalorder %s3063_s28, %s3063_s28 }
  0x56   : > { %p2856_p11 = scmp.ne.s32.totalorder %s3063_s28, %s2855_s25  ;;  %p2864_p1 = scmp.lt.s32.totalorder %s2855_s25, %s2855_s25 }
  0x58   : > { %p2858_p12 = pnand %p2856_p11, %p3067_p7  ;;  %p2865_p4 = por %p2864_p1, %p2863_p0 }
  0x5a   : > { %p2859_p13 = pneg %p2858_p12 }
  0x5c   : > { %p2866_p6 = pnand %p2865_p4, %p2859_p13 }
  0x5e   : > { %2869 = shalt.err (!%p2866_p6)
}
  0x5f   : > { %s2948_s18 = smov 128   ;;  %s2949_s15 = smov 8  }
  0x60   : > { %2514 = dma.hbm_to_vmem [thread:$0]  (!%p3059_p5), %s3690_s6, 8192, %s3063_s28, [#allocation6], %s2948_s18, %s2948_s18, %s2949_s15  }
  0x61   : > { %s3691_s11 = sld [smem:[#allocation33_spill]]  ;;  %s3692_s13 = sld [smem:[#allocation35_spill]] }
  0x67   : > { %s444_s20 = sshll.u32 %s3691_s11, 4  ;;  %s466_s29 = sshll.u32 %s3692_s13, 4  ;;  %s445_s20 = int_to_ptr.vmem [resolvable:$true] %s444_s20  ;;  %s467_s29 = int_to_ptr.vmem [resolvable:$true] %s466_s29 }
  0x68   : > { %s2870_s21 = scalar_lea.vmem %s445_s20, 32  ;;  %p2878_p11 = scmp.lt.s32.totalorder %s445_s20, %s445_s20 }
  0x69   : > { %p2871_p8 = scmp.ne.s32.totalorder %s445_s20, %s2870_s21  ;;  %p2879_p12 = scmp.lt.s32.totalorder %s2870_s21, %s2870_s21 }
  0x6b   : > { %p2873_p9 = pnand %p2871_p8, %p3067_p7  ;;  %p2880_p13 = por %p2879_p12, %p2878_p11 }
  0x6d   : > { %p2874_p10 = pneg %p2873_p9 }
  0x6f   : > { %p2881_p0 = pnand %p2880_p13, %p2874_p10 }
  0x71   : > { %2884 = shalt.err (!%p2881_p0)
}
  0x72   : > { %s2950_s28 = smov [#allocation7]   ;;  %s2885_s25 = scalar_lea.vmem %s467_s29, 128 }
  0x73   : > { %2517 = dma.vmem_to_smem (!%p3059_p5), %s445_s20, 32, %s2950_s28, [#allocation4]  }
  0x74   : > { %p2886_p1 = scmp.ne.s32.totalorder %s467_s29, %s2885_s25  ;;  %p2893_p2 = scmp.lt.s32.totalorder %s467_s29, %s467_s29 }
  0x75   : > { %p2894_p3 = scmp.lt.s32.totalorder %s2885_s25, %s2885_s25 }
  0x76   : > { %p2888_p4 = pnand %p2886_p1, %p3067_p7 }
  0x77   : > { %p2895_p8 = por %p2894_p3, %p2893_p2 }
  0x78   : > { %p2889_p6 = pneg %p2888_p4 }
  0x7a   : > { %p2896_p9 = pnand %p2895_p8, %p2889_p6 }
  0x7c   : > { %2899 = shalt.err (!%p2896_p9)
}
  0x7d   : > { %s2951_s18 = smov [#allocation10]   ;;  %s3693_s14 = sld [smem:[#allocation36_spill]] }
  0x7e   : > { %2523 = dma.vmem_to_smem (!%p3059_p5), %s467_s29, 128, %s2951_s18, [#allocation9]  }
  0x83   : > { %s477_s12 = sshll.u32 %s3693_s14, 4  ;;  %s478_s12 = int_to_ptr.vmem [resolvable:$true] %s477_s12 }
  0x84   : > { %s2900_s17 = scalar_lea.vmem %s478_s12, 16  ;;  %p2908_p13 = scmp.lt.s32.totalorder %s478_s12, %s478_s12 }
  0x85   : > { %p2901_p10 = scmp.ne.s32.totalorder %s478_s12, %s2900_s17  ;;  %p2909_p0 = scmp.lt.s32.totalorder %s2900_s17, %s2900_s17 }
  0x87   : > { %p2903_p11 = pnand %p2901_p10, %p3067_p7  ;;  %p2910_p2 = por %p2909_p0, %p2908_p13 }
  0x89   : > { %p2904_p12 = pneg %p2903_p11 }
  0x8b   : > { %p2911_p3 = pnand %p2910_p2, %p2904_p12 }
  0x8d   : > { %2914 = shalt.err (!%p2911_p3)
}
  0x8e   : > { %s2952_s19 = smov [#allocation11]   ;;  %p3694_p1 = scmp.ne.s32.totalorder %s3686_s23, 0 }
  0x8f   : > { %2526 = dma.vmem_to_smem (!%p3059_p5), %s478_s12, 16, %s2952_s19, [#allocation12]  }
  0x90   : > { %498 = sbr.rel (%p3694_p1) target bundleno = 1473 (0x5c1), region = 80 }
  0x97   : > { %p3695_p4 = scmp.eq.s32.totalorder %s3044_s22, 0 }
  0x99   : > { %2920 = dma.done.wait (%p3695_p4), [#allocation3], 8192   ;;  %p3696_p6 = pmov %p3695_p4 }
  0x9a   : > { %p3697_p7 = pmov %p3695_p4 }
  0x9b   : > { %2922 = vsyncadd (%p3696_p6), [#allocation3], 4294959104 }
  0x9c   : > { %2924 = dma.done.wait (%p3697_p7), [#allocation6], 8192   ;;  %p3698_p8 = pmov %p3695_p4 }
  0x9d   : > { %p3699_p9 = pmov %p3695_p4 }
  0x9e   : > { %2926 = vsyncadd (%p3698_p8), [#allocation6], 4294959104 }
  0x9f   : > { %2928 = dma.done.wait (%p3699_p9), [#allocation4], 32   ;;  %p3700_p5 = pmov %p3695_p4 }
  0xa0   : > { %p3701_p10 = pmov %p3695_p4 }
  0xa1   : > { %2930 = vsyncadd (%p3700_p5), [#allocation4], 4294967264 }
  0xa2   : > { %2932 = dma.done.wait (%p3701_p10), [#allocation9], 144   ;;  %p3702_p11 = pmov %p3695_p4 }
  0xa3   : > { %p3703_p12 = pmov %p3695_p4 }
  0xa4   : > { %2934 = vsyncadd (%p3702_p11), [#allocation9], 4294967152 }
  0xa5   : > { %2936 = dma.done.wait (%p3703_p12), [#allocation12], 16   ;;  %p3704_p13 = pmov %p3695_p4 }
  0xa7   : > { %2938 = vsyncadd (%p3704_p13), [#allocation12], 4294967280 }
  0xa8   : > { %524 = sfence }
  0xa9   : > { %s3705_s1 = sld [smem:[#allocation23_spill]]  ;;  %v2953_v1 = vmov 0   ;;  %v2561_v2 = vld [vmem:[#allocation2 + $0x4] ss:$16 sps:$4 sm:$0xff]   ;;  %v2563_v3 = vld [vmem:[#allocation2] ss:$16 sps:$4 sm:$0xff]  }
  0xaa   : > { %2559 = vset.pattern.permute.xlu0 %v2953_v1  ;;  %2560 = vset.pattern.permute.xlu1 %v2953_v1  ;;  %s3706_s2 = sld [smem:[#allocation24_spill]]  ;;  %v2564_v5 = vld [vmem:[#allocation2 + $0x24] ss:$16 sps:$4 sm:$0xff]   ;;  %v2566_v6 = vld [vmem:[#allocation2 + $0x20] ss:$16 sps:$4 sm:$0xff]   ;;  %s3707_s8 = sld [smem:[#allocation30_spill]] }
  0xab   : > { %1051 = vmatprep.subr.bf16.mxu1 %v2561_v2  ;;  %v2567_v7 = vld [vmem:[#allocation2 + $0x44] ss:$16 sps:$4 sm:$0xff]   ;;  %v2569_v9 = vld [vmem:[#allocation2 + $0x40] ss:$16 sps:$4 sm:$0xff]   ;;  %p567_p0 = scmp.lt.s32.totalorder %s3044_s22, 1  ;;  %s3709_s0 = sld [smem:[#allocation22_spill]] }
  0xac   : > { %1052 = vmatpush1.bf16.msra.mxu1 %v2563_v3  ;;  %v2570_v10 = vld [vmem:[#allocation2 + $0x64] ss:$16 sps:$4 sm:$0xff]   ;;  %v2572_v11 = vld [vmem:[#allocation2 + $0x60] ss:$16 sps:$4 sm:$0xff]   ;;  %vm582_vm0 = vcmask 1043456   ;;  %s3204_s18 = sld [smem:[#allocation7]] }
  0xad   : > { %1053 = vmatprep.subr.bf16.mxu1 %v2564_v5  ;;  %v2573_v12 = vld [vmem:[#allocation2 + $0x84] ss:$16 sps:$4 sm:$0xff]   ;;  %s3724_s22 = smov (!%p567_p0, %s3044_s22), 1  ;;  %v2575_v13 = vld [vmem:[#allocation2 + $0x80] ss:$16 sps:$4 sm:$0xff]   ;;  %s3206_s15 = sld [smem:[#allocation7 + $0x1]] }
  0xae   : > { %3708 = sst [smem:[#allocation19_spill]] %s3724_s22  ;;  %v2576_v14 = vld [vmem:[#allocation2 + $0xa4] ss:$16 sps:$4 sm:$0xff]   ;;  %s3664_s29 = sshll.u32 %s3724_s22, 3  ;;  %v2578_v15 = vld [vmem:[#allocation2 + $0xa0] ss:$16 sps:$4 sm:$0xff]  }
  0xaf   : > { %v634_v0 = vld [vmem:[%s3705_s1] sm:$0xf]  ;;  %v2579_v16 = vld [vmem:[#allocation2 + $0xc4] ss:$16 sps:$4 sm:$0xff]   ;;  %v2612_v54 = vld [vmem:[#allocation2 + $0xc] ss:$16 sps:$4 sm:$0xff]  }
  0xb0   : > { %637 = vperm.xlu0 %2559, %v634_v0   ;;  %v648_v4 = vld [vmem:[%s3706_s2] sm:$0xf]  ;;  %1054 = vmatpush1.bf16.msra.mxu1 %v2566_v6  ;;  %v2582_v19 = vld [vmem:[#allocation2 + $0xe4] ss:$16 sps:$4 sm:$0xff]   ;;  %s3208_s16 = sld [smem:[#allocation7 + $0x2]]  ;;  %s3210_s12 = sld [smem:[#allocation7 + $0x3]] }
  0xb1   : > { %v2022_v8 = vld [vmem:[%s3707_s8] sm:$0xff]  ;;  %1055 = vmatprep.subr.bf16.mxu1 %v2567_v7  ;;  %s3185_s25 = scalar_lea.vmem %s3709_s0, %s3664_s29  ;;  %s3212_s17 = sld [smem:[#allocation7 + $0x4]]  ;;  %vm2032_vm1 = vcmask 1041408   ;;  %vm2028_vm2 = vcmask 31744   ;;  %vm2107_vm3 = vcmask 64512  }
  0xb2   : > { %3710 = sst [smem:[#allocation20_spill]] %s3185_s25  ;;  %v2581_v17 = vld [vmem:[#allocation2 + $0xc0] ss:$16 sps:$4 sm:$0xff]   ;;  %v2585_v22 = vld [vmem:[#allocation2 + $0x104] ss:$16 sps:$4 sm:$0xff]   ;;  %s3214_s19 = sld [smem:[#allocation7 + $0x5]] }
  0xb3   : > { %v578_v18 = vld [vmem:[%s3185_s25] sm:$0xff]  ;;  %s3216_s23 = sld [smem:[#allocation7 + $0x6]]  ;;  %s3218_s26 = sld [smem:[#allocation7 + $0x7]] }
  0xb4   : > { %651 = vperm.xlu0 %2559, %v648_v4   ;;  %1056 = vmatpush1.bf16.msra.mxu1 %v2569_v9  ;;  %v3188_v20 = vcombine.high %v578_v18, %v578_v18  ;;  %v2584_v21 = vld [vmem:[#allocation2 + $0xe0] ss:$16 sps:$4 sm:$0xff]   ;;  %v583_v23 = vsel %vm582_vm0, %v578_v18, 0.0  ;;  %v2588_v26 = vld [vmem:[#allocation2 + $0x124] ss:$16 sps:$4 sm:$0xff]   ;;  %s3220_s30 = sld [smem:[#allocation7 + $0x80]] }
  0xb5   : > { %1057 = vmatprep.subr.bf16.mxu1 %v2570_v10  ;;  %v2587_v25 = vld [vmem:[#allocation2 + $0x100] ss:$16 sps:$4 sm:$0xff]   ;;  %v584_v27 = vrot.slane %v583_v23, 4  ;;  %v2591_v30 = vld [vmem:[#allocation2 + $0x144] ss:$16 sps:$4 sm:$0xff]   ;;  %s3222_s20 = sld [smem:[#allocation7 + $0x81]] }
  0xb6   : > { %v590_v24 = vsel %vm582_vm0, %v3188_v20, 0.0  ;;  %v2590_v29 = vld [vmem:[#allocation2 + $0x120] ss:$16 sps:$4 sm:$0xff]   ;;  %v2594_v34 = vld [vmem:[#allocation2 + $0x164] ss:$16 sps:$4 sm:$0xff]   ;;  %s3224_s24 = sld [smem:[#allocation7 + $0x82]] }
  0xb7   : > { %v591_v28 = vrot.slane %v590_v24, 4  ;;  %v585_v31 = vadd.f32 %v584_v27, %v583_v23  ;;  %v2593_v33 = vld [vmem:[#allocation2 + $0x140] ss:$16 sps:$4 sm:$0xff]   ;;  %v2597_v38 = vld [vmem:[#allocation2 + $0x184] ss:$16 sps:$4 sm:$0xff]   ;;  %s3226_s27 = sld [smem:[#allocation7 + $0x83]] }
  0xb8   : > { %2025 = vperm.xlu0 %2559, %v2022_v8   ;;  %1058 = vmatpush1.bf16.msra.mxu1 %v2572_v11  ;;  %v2596_v37 = vld [vmem:[#allocation2 + $0x160] ss:$16 sps:$4 sm:$0xff]   ;;  %v2601_v42 = vld [vmem:[#allocation2 + $0x1a4] ss:$16 sps:$4 sm:$0xff]   ;;  %s3228_s21 = sld [smem:[#allocation7 + $0x84]]  ;;  %s3230_s28 = sld [smem:[#allocation7 + $0x85]] }
  0xb9   : > { %1059 = vmatprep.subr.bf16.mxu1 %v2573_v12  ;;  %v592_v32 = vadd.f32 %v591_v28, %v590_v24  ;;  %v586_v35 = vrot.slane %v585_v31, 2  ;;  %v2599_v41 = vld [vmem:[#allocation2 + $0x180] ss:$16 sps:$4 sm:$0xff]   ;;  %v2604_v46 = vld [vmem:[#allocation2 + $0x1c4] ss:$16 sps:$4 sm:$0xff]   ;;  %s3232_s29 = sld [smem:[#allocation7 + $0x86]] }
  0xba   : > { %v2603_v45 = vld [vmem:[#allocation2 + $0x1a0] ss:$16 sps:$4 sm:$0xff]   ;;  %v2607_v50 = vld [vmem:[#allocation2 + $0x1e4] ss:$16 sps:$4 sm:$0xff]   ;;  %s3234_s0 = sld [smem:[#allocation7 + $0x87]]  ;;  %s3236_s1 = sld [smem:[#allocation8]] }
  0xbb   : > { %v593_v36 = vrot.slane %v592_v32, 2  ;;  %v587_v39 = vadd.f32 %v586_v35, %v585_v31  ;;  %v2606_v49 = vld [vmem:[#allocation2 + $0x1c0] ss:$16 sps:$4 sm:$0xff]   ;;  %v2615_v35 = vld [vmem:[#allocation2 + $0x2c] ss:$16 sps:$4 sm:$0xff]   ;;  %s3238_s2 = sld [smem:[#allocation8 + $0x1]] }
  0xbc   : > { %1060 = vmatpush1.bf16.msra.mxu1 %v2575_v13  ;;  %v2609_v53 = vld [vmem:[#allocation2 + $0x1e0] ss:$16 sps:$4 sm:$0xff]   ;;  %s3240_s5 = sld [smem:[#allocation8 + $0x2]]  ;;  %s3242_s6 = sld [smem:[#allocation8 + $0x3]] }
  0xbd   : > { %1061 = vmatprep.subr.bf16.mxu1 %v2576_v14  ;;  %v594_v40 = vadd.f32 %v593_v36, %v592_v32  ;;  %v588_v43 = vrot.slane %v587_v39, 1  ;;  %v2954_v14 = vmov 839922192   ;;  %v2613_v36 = vld [vmem:[#allocation2 + $0x28] ss:$16 sps:$4 sm:$0xff]   ;;  %s3244_s8 = sld [smem:[#allocation8 + $0x4]] }
  0xbe   : > { %s3246_s11 = sld [smem:[#allocation8 + $0x5]]  ;;  %s3248_s13 = sld [smem:[#allocation11]] }
  0xbf   : > { %v595_v44 = vrot.slane %v594_v40, 1  ;;  %v589_v47 = vadd.f32 %v588_v43, %v587_v39  ;;  %v2621_v39 = vld [vmem:[#allocation2 + $0x6c] ss:$16 sps:$4 sm:$0xff]   ;;  %s3250_s14 = sld [smem:[#allocation8 + $0x6]]  ;;  %s3252_s9 = sld [smem:[#allocation10]] }
  0xc0   : > { %1062 = vmatpush1.bf16.msra.mxu1 %v2578_v15  ;;  %v640_v15 = vunpack.c.l.s4 %v2954_v14  ;;  %v2627_v43 = vld [vmem:[#allocation2 + $0xac] ss:$16 sps:$4 sm:$0xff]   ;;  %s3254_s22 = sld [smem:[#allocation8 + $0x7]]  ;;  %s3256_s7 = sld [smem:[#allocation10 + $0x80]] }
  0xc1   : > { %1063 = vmatprep.subr.bf16.mxu1 %v2579_v16  ;;  %v596_v48 = vadd.f32 %v595_v44, %v594_v40  ;;  %v598_v51 = vmul.f32 0.25, %v589_v47  ;;  %v642_v16 = vlaneseq  ;;  %v2619_v40 = vld [vmem:[#allocation2 + $0x68] ss:$16 sps:$4 sm:$0xff]   ;;  %v2633_v47 = vld [vmem:[#allocation2 + $0xec] ss:$16 sps:$4 sm:$0xff]   ;;  %s3258_s25 = sld [smem:[#allocation10 + $0x100]] }
  0xc2   : > { %v2625_v44 = vld [vmem:[#allocation2 + $0xa8] ss:$16 sps:$4 sm:$0xff]   ;;  %v2676_v14 = vld [vmem:[#allocation5 + $0x64] ss:$8 sps:$4 sm:$0xff]   ;;  %s3260_s10 = sld [smem:[#allocation10 + $0x180]] }
  0xc3   : > { %v599_v52 = vmul.f32 0.25, %v596_v48  ;;  %v2631_v48 = vld [vmem:[#allocation2 + $0xe8] ss:$16 sps:$4 sm:$0xff]   ;;  %s3262_s4 = sld [smem:[#allocation10 + $0x200]] }
  0xc4   : > { %1064 = vmatpush1.bf16.msra.mxu1 %v2581_v17  ;;  %s3265_s3 = sld [smem:[#allocation10 + $0x280]] }
  0xc5   : > { %1065 = vmatprep.subr.bf16.mxu1 %v2582_v19  ;;  %v602_v55 = vcombine.low %v598_v51, %v599_v52  ;;  %v643_v19 = vshrl.u32 %v642_v16, 7  ;;  %v2639_v51 = vld [vmem:[#allocation2 + $0x12c] ss:$16 sps:$4 sm:$0xff]   ;;  %v2637_v52 = vld [vmem:[#allocation2 + $0x128] ss:$16 sps:$4 sm:$0xff]   ;;  %3711 = sst [smem:[#allocation21_spill]] %s3252_s9 }
  0xc6   : > { %v2679_v16 = vld [vmem:[#allocation5 + $0x74] ss:$8 sps:$4 sm:$0xff]   ;;  %s3267_s9 = sld [smem:[#allocation10 + $0x300]] }
  0xc7   : > { %v604_v56 = vsub.f32 %v578_v18, %v602_v55  ;;  %v641_v18 = vunpack.c.0.s8 %v640_v15  ;;  %v2645_v55 = vld [vmem:[#allocation2 + $0x16c] ss:$16 sps:$4 sm:$0xff]   ;;  %v2678_v15 = vld [vmem:[#allocation5 + $0x60] ss:$8 sps:$4 sm:$0xff]  }
  0xc8   : > { %1066 = vmatpush1.bf16.msra.mxu1 %v2584_v21 }
  0xc9   : > { %1067 = vmatprep.subr.bf16.mxu1 %v2585_v22  ;;  %v605_v57 = vmul.f32 %v604_v56, %v604_v56  ;;  %v644_v22 = vsub.s32 %v641_v18, %v643_v19  ;;  %v2682_v18 = vld [vmem:[#allocation5 + $0x84] ss:$8 sps:$4 sm:$0xff]   ;;  %v2684_v19 = vld [vmem:[#allocation5 + $0x80] ss:$8 sps:$4 sm:$0xff]  }
  0xcb   : > { %v607_v58 = vcombine.high %v605_v57, %v605_v57  ;;  %v609_v59 = vsel %vm582_vm0, %v605_v57, 0.0  ;;  %v2648_v57 = vld [vmem:[#allocation2 + $0x18c] ss:$16 sps:$4 sm:$0xff]  }
  0xcc   : > { %1068 = vmatpush1.bf16.msra.mxu1 %v2587_v25  ;;  %v610_v61 = vrot.slane %v609_v59, 4 }
  0xcd   : > { %1069 = vmatprep.subr.bf16.mxu1 %v2588_v26  ;;  %v616_v60 = vsel %vm582_vm0, %v607_v58, 0.0  ;;  %v2646_v58 = vld [vmem:[#allocation2 + $0x188] ss:$16 sps:$4 sm:$0xff]  }
  0xce   : > { %v617_v62 = vrot.slane %v616_v60, 4  ;;  %v611_v63 = vadd.f32 %v610_v61, %v609_v59  ;;  %v2651_v59 = vld [vmem:[#allocation2 + $0x1ac] ss:$16 sps:$4 sm:$0xff]  }
  0xcf   : > { %v2654_v61 = vld [vmem:[#allocation2 + $0x1cc] ss:$16 sps:$4 sm:$0xff]  }
  0xd0   : > { %1070 = vmatpush1.bf16.msra.mxu1 %v2590_v29  ;;  %v618_v0 = vadd.f32 %v617_v62, %v616_v60  ;;  %v612_v2 = vrot.slane %v611_v63, 2  ;;  %v2649_v60 = vld [vmem:[#allocation2 + $0x1a8] ss:$16 sps:$4 sm:$0xff]  }
  0xd1   : > { %1071 = vmatprep.subr.bf16.mxu1 %v2591_v30  ;;  %v2652_v62 = vld [vmem:[#allocation2 + $0x1c8] ss:$16 sps:$4 sm:$0xff]  }
  0xd2   : > { %v619_v3 = vrot.slane %v618_v0, 2  ;;  %v613_v4 = vadd.f32 %v612_v2, %v611_v63  ;;  %v2657_v63 = vld [vmem:[#allocation2 + $0x1ec] ss:$16 sps:$4 sm:$0xff]  }
  0xd3   : > { %v2658_v2 = vld [vmem:[#allocation5 + $0x4] ss:$8 sps:$4 sm:$0xff]  }
  0xd4   : > { %1072 = vmatpush1.bf16.msra.mxu1 %v2593_v33  ;;  %v620_v5 = vadd.f32 %v619_v3, %v618_v0  ;;  %v614_v6 = vrot.slane %v613_v4, 1  ;;  %v2610_v33 = vld [vmem:[#allocation2 + $0x8] ss:$16 sps:$4 sm:$0xff]   ;;  %1879 = vmatprep.subr.bf16.mxu0 %v2658_v2 }
  0xd5   : > { %1073 = vmatprep.subr.bf16.mxu1 %v2594_v34  ;;  %v2655_v0 = vld [vmem:[#allocation2 + $0x1e8] ss:$16 sps:$4 sm:$0xff]  }
  0xd6   : > { %v621_v7 = vrot.slane %v620_v5, 1  ;;  %v615_v8 = vadd.f32 %v614_v6, %v613_v4  ;;  %v2660_v3 = vld [vmem:[#allocation5] ss:$8 sps:$4 sm:$0xff]   ;;  %v2661_v4 = vld [vmem:[#allocation5 + $0x14] ss:$8 sps:$4 sm:$0xff]  }
  0xd7   : > { %1880 = vmatpush1.bf16.msra.mxu0 %v2660_v3  ;;  %v2664_v6 = vld [vmem:[#allocation5 + $0x24] ss:$8 sps:$4 sm:$0xff]   ;;  %v1216_v3 = vstv %s3256_s7  ;;  %s3520_s7 = sld [smem:[#allocation10 + $0x281]] }
  0xd8   : > { %1074 = vmatpush1.bf16.msra.mxu1 %v2596_v37  ;;  %v622_v9 = vadd.f32 %v621_v7, %v620_v5  ;;  %v623_v10 = vmul.f32 0.25, %v615_v8  ;;  %v2618_v37 = vld [vmem:[#allocation2 + $0x4c] ss:$16 sps:$4 sm:$0xff]   ;;  %v2663_v5 = vld [vmem:[#allocation5 + $0x10] ss:$8 sps:$4 sm:$0xff]   ;;  %1881 = vmatprep.subr.bf16.mxu0 %v2661_v4  ;;  %v1260_v4 = vstv %s3258_s25 }
  0xd9   : > { %1075 = vmatprep.subr.bf16.mxu1 %v2597_v38  ;;  %v2616_v38 = vld [vmem:[#allocation2 + $0x48] ss:$16 sps:$4 sm:$0xff]   ;;  %v2667_v8 = vld [vmem:[#allocation5 + $0x34] ss:$8 sps:$4 sm:$0xff]  }
  0xda   : > { %v624_v11 = vmul.f32 0.25, %v622_v9  ;;  %v625_v12 = vadd.f32 1e-05, %v623_v10  ;;  %v2666_v7 = vld [vmem:[#allocation5 + $0x20] ss:$8 sps:$4 sm:$0xff]  }
  0xdb   : > { %1882 = vmatpush1.bf16.msra.mxu0 %v2663_v5  ;;  %v2669_v9 = vld [vmem:[#allocation5 + $0x30] ss:$8 sps:$4 sm:$0xff]   ;;  %v2670_v10 = vld [vmem:[#allocation5 + $0x44] ss:$8 sps:$4 sm:$0xff]   ;;  %v1304_v5 = vstv %s3260_s10  ;;  %s3562_s10 = sld [smem:[#allocation10 + $0x301]] }
  0xdc   : > { %1076 = vmatpush1.bf16.msra.mxu1 %v2599_v41  ;;  %v626_v13 = vadd.f32 1e-05, %v624_v11  ;;  %2754 = vrsqrt.f32 %v625_v12  ;;  %v2624_v41 = vld [vmem:[#allocation2 + $0x8c] ss:$16 sps:$4 sm:$0xff]   ;;  %1883 = vmatprep.subr.bf16.mxu0 %v2664_v6  ;;  %v2672_v11 = vld [vmem:[#allocation5 + $0x40] ss:$8 sps:$4 sm:$0xff]  }
  0xdd   : > { %1077 = vmatprep.subr.bf16.mxu1 %v2601_v42  ;;  %v2622_v42 = vld [vmem:[#allocation2 + $0x88] ss:$16 sps:$4 sm:$0xff]   ;;  %v2673_v12 = vld [vmem:[#allocation5 + $0x54] ss:$8 sps:$4 sm:$0xff]  }
  0xde   : > { %2756 = vrsqrt.f32 %v626_v13  ;;  %v2675_v13 = vld [vmem:[#allocation5 + $0x50] ss:$8 sps:$4 sm:$0xff]  }
  0xdf   : > { %1884 = vmatpush1.bf16.msra.mxu0 %v2666_v7  ;;  %v1348_v7 = vstv %s3262_s4  ;;  %s3596_s4 = sld [smem:[#allocation10 + $0x381]] }
  0xe0   : > { %1078 = vmatpush1.bf16.msra.mxu1 %v2603_v45  ;;  %v2630_v45 = vld [vmem:[#allocation2 + $0xcc] ss:$16 sps:$4 sm:$0xff]   ;;  %1885 = vmatprep.subr.bf16.mxu0 %v2667_v8  ;;  %v1392_v8 = vstv %s3265_s3  ;;  %s3590_s3 = sld [smem:[#allocation10 + $0x380]] }
  0xe1   : > { %1079 = vmatprep.subr.bf16.mxu1 %v2604_v46  ;;  %v2628_v46 = vld [vmem:[#allocation2 + $0xc8] ss:$16 sps:$4 sm:$0xff]  }
  0xe3   : > { %1886 = vmatpush1.bf16.msra.mxu0 %v2669_v9  ;;  %v1436_v9 = vstv %s3267_s9  ;;  %s3716_s9 = sld [smem:[#allocation20_spill]] }
  0xe4   : > { %1080 = vmatpush1.bf16.msra.mxu1 %v2606_v49  ;;  %v2636_v49 = vld [vmem:[#allocation2 + $0x10c] ss:$16 sps:$4 sm:$0xff]   ;;  %1887 = vmatprep.subr.bf16.mxu0 %v2670_v10 }
  0xe5   : > { %1081 = vmatprep.subr.bf16.mxu1 %v2607_v50  ;;  %v2634_v50 = vld [vmem:[#allocation2 + $0x108] ss:$16 sps:$4 sm:$0xff]  }
  0xe6   : > { %v2755_v17 = vpop.eup %2754 }
  0xe7   : > { %1888 = vmatpush1.bf16.msra.mxu0 %v2672_v11 }
  0xe8   : > { %1082 = vmatpush1.bf16.msra.mxu1 %v2609_v53  ;;  %v2757_v21 = vpop.eup %2756  ;;  %v2642_v53 = vld [vmem:[#allocation2 + $0x14c] ss:$16 sps:$4 sm:$0xff]   ;;  %1889 = vmatprep.subr.bf16.mxu0 %v2673_v12 }
  0xe9   : > { %1092 = vmatprep.subr.bf16.mxu1 %v2612_v54  ;;  %v631_v23 = vcombine.low %v2755_v17, %v2757_v21  ;;  %v2640_v54 = vld [vmem:[#allocation2 + $0x148] ss:$16 sps:$4 sm:$0xff]   ;;  %v2685_v21 = vld [vmem:[#allocation5 + $0x94] ss:$8 sps:$4 sm:$0xff]  }
  0xea   : > { %v2681_v17 = vld [vmem:[#allocation5 + $0x70] ss:$8 sps:$4 sm:$0xff]  }
  0xeb   : > { %v633_v25 = vmul.f32 %v631_v23, %v604_v56  ;;  %v2643_v56 = vld [vmem:[#allocation2 + $0x168] ss:$16 sps:$4 sm:$0xff]   ;;  %1890 = vmatpush1.bf16.msra.mxu0 %v2675_v13  ;;  %v2688_v23 = vld [vmem:[#allocation5 + $0xa4] ss:$8 sps:$4 sm:$0xff]  }
  0xec   : > { %1891 = vmatprep.subr.bf16.mxu0 %v2676_v14 }
  0xef   : > { %1892 = vmatpush1.bf16.msra.mxu0 %v2678_v15 }
  0xf0   : > { %1893 = vmatprep.subr.bf16.mxu0 %v2679_v16 }
  0xf3   : > { %1894 = vmatpush1.bf16.msra.mxu0 %v2681_v17 }
  0xf4   : > { %1895 = vmatprep.subr.bf16.mxu0 %v2682_v18 }
  0xf7   : > { %1896 = vmatpush1.bf16.msra.mxu0 %v2684_v19 }
  0xf8   : > { %1897 = vmatprep.subr.bf16.mxu0 %v2685_v21 }
 0x12f   : > { %v638_v24 = vpop.permute.xlu0 %637 }
 0x130   : > { %v645_v26 = vrot.slane %v638_v24, %v644_v22  ;;  %v2690_v24 = vld [vmem:[#allocation5 + $0xa0] ss:$8 sps:$4 sm:$0xff]  }
 0x132   : > { %v647_v28 = vmul.f32 %v645_v26, %v633_v25  ;;  %v2691_v25 = vld [vmem:[#allocation5 + $0xb4] ss:$8 sps:$4 sm:$0xff]   ;;  %v2693_v26 = vld [vmem:[#allocation5 + $0xb0] ss:$8 sps:$4 sm:$0xff]  }
 0x133   : > { %v652_v27 = vpop.permute.xlu0 %651 }
 0x134   : > { %v659_v29 = vrot.slane %v652_v27, %v644_v22  ;;  %v2687_v22 = vld [vmem:[#allocation5 + $0x90] ss:$8 sps:$4 sm:$0xff]   ;;  %v2694_v27 = vld [vmem:[#allocation5 + $0xc4] ss:$8 sps:$4 sm:$0xff]  }
 0x135   : > { %1898 = vmatpush1.bf16.msra.mxu0 %v2687_v22 }
 0x136   : > { %v661_v30 = vadd.f32 %v659_v29, %v647_v28  ;;  %1899 = vmatprep.subr.bf16.mxu0 %v2688_v23  ;;  %v2696_v28 = vld [vmem:[#allocation5 + $0xc0] ss:$8 sps:$4 sm:$0xff]   ;;  %v2697_v29 = vld [vmem:[#allocation5 + $0xd4] ss:$8 sps:$4 sm:$0xff]  }
 0x138   : > { %v663_v31 = vcombine.high %v661_v30, %v661_v30  ;;  %v3195_v34 = vpack.c.bf16 %v661_v30, %v661_v30  ;;  %v2699_v30 = vld [vmem:[#allocation5 + $0xd0] ss:$8 sps:$4 sm:$0xff]  }
 0x139   : > { %1900 = vmatpush1.bf16.msra.mxu0 %v2690_v24 }
 0x13a   : > { %v666_v32 = vpack.c.bf16 %v663_v31, %v663_v31  ;;  %1901 = vmatprep.subr.bf16.mxu0 %v2691_v25  ;;  %v2700_v31 = vld [vmem:[#allocation5 + $0xe4] ss:$8 sps:$4 sm:$0xff]  }
 0x13c   : > { %1083 = vmatprep.mubr.bf16.mxu1 %v666_v32 }
 0x13d   : > { %1084 = vmatmul.mubr.bf16.vlgmr.msra.gmra.mrb[0].mxu1 %v3195_v34  ;;  %1902 = vmatpush1.bf16.msra.mxu0 %v2693_v26 }
 0x13e   : > { %1093 = vmatpush1.bf16.msra.mxu1 %v2610_v33  ;;  %1124 = vmatprep.mubr.bf16.mxu1 %v666_v32  ;;  %v2702_v32 = vld [vmem:[#allocation5 + $0xe0] ss:$8 sps:$4 sm:$0xff]   ;;  %v2703_v33 = vld [vmem:[#allocation5 + $0xf4] ss:$8 sps:$4 sm:$0xff]  }
 0x13f   : > { %1094 = vmatprep.subr.bf16.mxu1 %v2615_v35  ;;  %1903 = vmatprep.subr.bf16.mxu0 %v2694_v27 }
 0x141   : > { %1904 = vmatpush1.bf16.msra.mxu0 %v2696_v28 }
 0x142   : > { %1095 = vmatpush1.bf16.msra.mxu1 %v2613_v36  ;;  %1905 = vmatprep.subr.bf16.mxu0 %v2697_v29 }
 0x143   : > { %1096 = vmatprep.subr.bf16.mxu1 %v2618_v37 }
 0x145   : > { %1906 = vmatpush1.bf16.msra.mxu0 %v2699_v30 }
 0x146   : > { %1097 = vmatpush1.bf16.msra.mxu1 %v2616_v38  ;;  %1907 = vmatprep.subr.bf16.mxu0 %v2700_v31 }
 0x147   : > { %1098 = vmatprep.subr.bf16.mxu1 %v2621_v39  ;;  %v2708_v39 = vld [vmem:[#allocation5 + $0x104] ss:$8 sps:$4 sm:$0xff]  }
 0x149   : > { %1908 = vmatpush1.bf16.msra.mxu0 %v2702_v32 }
 0x14a   : > { %1099 = vmatpush1.bf16.msra.mxu1 %v2619_v40  ;;  %1909 = vmatprep.subr.bf16.mxu0 %v2703_v33  ;;  %v1140_v40 = vstv %s3204_s18  ;;  %s3712_s18 = sld [smem:[#allocation21_spill]] }
 0x14b   : > { %1100 = vmatprep.subr.bf16.mxu1 %v2624_v41  ;;  %v1184_v41 = vstv %s3206_s15  ;;  %s3285_s15 = sld [smem:[#allocation10 + $0x1]] }
 0x14e   : > { %1101 = vmatpush1.bf16.msra.mxu1 %v2622_v42  ;;  %v1228_v42 = vstv %s3208_s16  ;;  %s3303_s16 = sld [smem:[#allocation10 + $0x81]] }
 0x14f   : > { %1102 = vmatprep.subr.bf16.mxu1 %v2627_v43  ;;  %v1272_v43 = vstv %s3210_s12  ;;  %s3305_s12 = sld [smem:[#allocation10 + $0x101]] }
 0x150   : > { %v1172_v2 = vstv %s3712_s18  ;;  %s3721_s18 = sld [smem:[#allocation37_spill]] }
 0x151   : > { %v1178_v27 = vstv %s3285_s15 }
 0x152   : > { %1103 = vmatpush1.bf16.msra.mxu1 %v2625_v44  ;;  %v1316_v44 = vstv %s3212_s17  ;;  %s3311_s17 = sld [smem:[#allocation11 + $0x1]] }
 0x153   : > { %1104 = vmatprep.subr.bf16.mxu1 %v2630_v45  ;;  %v1360_v45 = vstv %s3214_s19  ;;  %s3313_s19 = sld [smem:[#allocation10 + $0x181]] }
 0x156   : > { %1105 = vmatpush1.bf16.msra.mxu1 %v2628_v46  ;;  %v1404_v46 = vstv %s3216_s23  ;;  %s3319_s23 = sld [smem:[#allocation10 + $0x201]] }
 0x157   : > { %1106 = vmatprep.subr.bf16.mxu1 %v2633_v47  ;;  %v1448_v47 = vstv %s3218_s26 }
 0x15a   : > { %1107 = vmatpush1.bf16.msra.mxu1 %v2631_v48  ;;  %v1144_v48 = vstv %s3220_s30  ;;  %s3715_s30 = sld [smem:[#allocation32_spill]] }
 0x15b   : > { %1108 = vmatprep.subr.bf16.mxu1 %v2636_v49  ;;  %v1188_v49 = vstv %s3222_s20 }
 0x15e   : > { %1109 = vmatpush1.bf16.msra.mxu1 %v2634_v50  ;;  %v1232_v50 = vstv %s3224_s24  ;;  %s3719_s24 = sld [smem:[#allocation31_spill]] }
 0x15f   : > { %1110 = vmatprep.subr.bf16.mxu1 %v2639_v51  ;;  %v1276_v51 = vstv %s3226_s27 }
 0x162   : > { %1111 = vmatpush1.bf16.msra.mxu1 %v2637_v52  ;;  %v1320_v52 = vstv %s3228_s21 }
 0x163   : > { %1112 = vmatprep.subr.bf16.mxu1 %v2642_v53  ;;  %v1150_v53 = vstv %s3236_s1 }
 0x166   : > { %1113 = vmatpush1.bf16.msra.mxu1 %v2640_v54  ;;  %v1364_v54 = vstv %s3230_s28 }
 0x167   : > { %1114 = vmatprep.subr.bf16.mxu1 %v2645_v55  ;;  %v1408_v55 = vstv %s3232_s29 }
 0x16a   : > { %1115 = vmatpush1.bf16.msra.mxu1 %v2643_v56  ;;  %v1452_v56 = vstv %s3234_s0 }
 0x16b   : > { %1116 = vmatprep.subr.bf16.mxu1 %v2648_v57  ;;  %v1194_v57 = vstv %s3238_s2  ;;  %s3713_s2 = sld [smem:[#allocation25_spill]] }
 0x16e   : > { %1117 = vmatpush1.bf16.msra.mxu1 %v2646_v58  ;;  %v1238_v58 = vstv %s3240_s5 }
 0x16f   : > { %1118 = vmatprep.subr.bf16.mxu1 %v2651_v59  ;;  %v1282_v59 = vstv %s3242_s6 }
 0x172   : > { %1119 = vmatpush1.bf16.msra.mxu1 %v2649_v60  ;;  %v1326_v60 = vstv %s3244_s8  ;;  %s3714_s8 = sld [smem:[#allocation26_spill]] }
 0x173   : > { %1120 = vmatprep.subr.bf16.mxu1 %v2654_v61  ;;  %v1370_v61 = vstv %s3246_s11 }
 0x176   : > { %1121 = vmatpush1.bf16.msra.mxu1 %v2652_v62  ;;  %v1134_v62 = vstv %s3248_s13 }
 0x177   : > { %1122 = vmatprep.subr.bf16.mxu1 %v2657_v63  ;;  %v1414_v63 = vstv %s3250_s14  ;;  %s3717_s14 = sld [smem:[#allocation29_spill]] }
 0x17a   : > { %1123 = vmatpush1.bf16.msra.mxu1 %v2655_v0  ;;  %v1458_v0 = vstv %s3254_s22  ;;  %s3718_s22 = sld [smem:[#allocation19_spill]] }
 0x17d   : > { %1125 = vmatmul.mubr.bf16.vlgmr.msra.gmra.mrb[4].mxu1 %v3195_v34  ;;  %v2705_v34 = vld [vmem:[#allocation5 + $0xf0] ss:$8 sps:$4 sm:$0xff]  }
 0x17e   : > { %2149 = vmatprep.mubr.bf16.mxu1 %v2953_v1  ;;  %1910 = vmatpush1.bf16.msra.mxu0 %v2705_v34 }
 0x17f   : > { %1920 = vmatprep.subr.bf16.mxu0 %v2708_v39 }
 0x180   : > { %s3720_s27 = sshll.u32 %s3718_s22, 3 }
 0x181   : > { %s576_s15 = scalar_lea.vmem %s3721_s18, %s3720_s27 }
 0x210   : > { %v3200_v35 = vpop.f32.mrb[0].mxu1 }
 0x211   : > { %v3202_v36 = vpop.f32.mrb[1].mxu1  ;;  %v1141_v6 = vmul.f32 %v1140_v40, %v3200_v35  ;;  %v1185_v10 = vmul.f32 %v1184_v41, %v3200_v35  ;;  %v1229_v11 = vmul.f32 %v1228_v42, %v3200_v35  ;;  %v1273_v12 = vmul.f32 %v1272_v43, %v3200_v35 }
 0x212   : > { %v1089_v37 = vpop.f32.mrb[2].mxu1  ;;  %v1317_v13 = vmul.f32 %v1316_v44, %v3200_v35  ;;  %v1361_v14 = vmul.f32 %v1360_v45, %v3200_v35  ;;  %v1405_v15 = vmul.f32 %v1404_v46, %v3200_v35  ;;  %v1449_v16 = vmul.f32 %v1448_v47, %v3200_v35 }
 0x213   : > { %v1090_v38 = vpop.f32.mrb[3].mxu1  ;;  %v1142_v17 = vmul.f32 %v1140_v40, %v3202_v36  ;;  %v1186_v18 = vmul.f32 %v1184_v41, %v3202_v36  ;;  %v1230_v19 = vmul.f32 %v1228_v42, %v3202_v36  ;;  %v1274_v21 = vmul.f32 %v1272_v43, %v3202_v36 }
 0x214   : > { %v1318_v22 = vmul.f32 %v1316_v44, %v3202_v36  ;;  %v1362_v23 = vmul.f32 %v1360_v45, %v3202_v36  ;;  %v1406_v24 = vmul.f32 %v1404_v46, %v3202_v36  ;;  %v3328_v25 = vmul.f32 %v1448_v47, %v3202_v36 }
 0x215   : > { %v1137_v47 = vstv %s3311_s17 }
 0x250   : > { %v1126_v26 = vpop.f32.mrb[4].mxu1 }
 0x251   : > { %v1145_v28 = vmul.f32 %v1144_v48, %v1126_v26  ;;  %v1189_v29 = vmul.f32 %v1188_v49, %v1126_v26  ;;  %v1233_v30 = vmul.f32 %v1232_v50, %v1126_v26  ;;  %v1277_v31 = vmul.f32 %v1276_v51, %v1126_v26  ;;  %v1128_v32 = vpop.f32.mrb[5].mxu1 }
 0x252   : > { %v1321_v33 = vmul.f32 %v1320_v52, %v1126_v26  ;;  %v1365_v34 = vmul.f32 %v1364_v54, %v1126_v26  ;;  %v1409_v35 = vmul.f32 %v1408_v55, %v1126_v26  ;;  %v1453_v36 = vmul.f32 %v1452_v56, %v1126_v26  ;;  %v1130_v37 = vpop.f32.mrb[6].mxu1 }
 0x253   : > { %v1147_v38 = vadd.f32 %v1145_v28, %v1141_v6  ;;  %v1191_v39 = vadd.f32 %v1189_v29, %v1185_v10  ;;  %v1235_v40 = vadd.f32 %v1233_v30, %v1229_v11  ;;  %v1279_v41 = vadd.f32 %v1277_v31, %v1273_v12  ;;  %v1131_v42 = vpop.f32.mrb[7].mxu1 }
 0x254   : > { %v1323_v43 = vadd.f32 %v1321_v33, %v1317_v13  ;;  %v1367_v44 = vadd.f32 %v1365_v34, %v1361_v14  ;;  %v3347_v45 = vadd.f32 %v1409_v35, %v1405_v15  ;;  %v3349_v46 = vadd.f32 %v1453_v36, %v1449_v16 }
 0x255   : > { %v1222_v26 = vstv %s3303_s16  ;;  %v1266_v6 = vstv %s3305_s12  ;;  %v1310_v28 = vstv %s3313_s19  ;;  %v1151_v10 = vadd.f32 %v1150_v53, %v1147_v38 }
 0x256   : > { %v1146_v11 = vmul.f32 %v1144_v48, %v1128_v32  ;;  %v1190_v12 = vmul.f32 %v1188_v49, %v1128_v32  ;;  %v1354_v13 = vstv %s3319_s23  ;;  %v1234_v14 = vmul.f32 %v1232_v50, %v1128_v32 }
 0x257   : > { %v1278_v15 = vmul.f32 %v1276_v51, %v1128_v32  ;;  %v1322_v16 = vmul.f32 %v1320_v52, %v1128_v32  ;;  %v1366_v29 = vmul.f32 %v1364_v54, %v1128_v32  ;;  %v1195_v30 = vadd.f32 %v1194_v57, %v1191_v39 }
 0x258   : > { %v1148_v48 = vadd.f32 %v1146_v11, %v1142_v17  ;;  %v1192_v31 = vadd.f32 %v1190_v12, %v1186_v18  ;;  %v1410_v49 = vmul.f32 %v1408_v55, %v1128_v32  ;;  %v1236_v33 = vadd.f32 %v1234_v14, %v1230_v19 }
 0x259   : > { %v1280_v50 = vadd.f32 %v1278_v15, %v1274_v21  ;;  %v1324_v34 = vadd.f32 %v1322_v16, %v1318_v22  ;;  %v3374_v35 = vadd.f32 %v1366_v29, %v1362_v23  ;;  %v1239_v51 = vadd.f32 %v1238_v58, %v1235_v40 }
 0x25a   : > { %v1152_v52 = vadd.f32 %v1150_v53, %v1148_v48  ;;  %v1196_v54 = vadd.f32 %v1194_v57, %v1192_v31  ;;  %v3382_v36 = vadd.f32 %v1410_v49, %v1406_v24  ;;  %v3386_v17 = vadd.f32 %v1282_v59, %v1279_v41  ;;  %v2011_v48 = vld [vmem:[%s3714_s8] sm:$0xf] }
 0x25b   : > { %v3390_v55 = vadd.f32 %v1326_v60, %v1323_v43  ;;  %v1240_v18 = vadd.f32 %v1238_v58, %v1236_v33  ;;  %v1155_v19 = vmul.f32 0.044715, %v1151_v10  ;;  %v3396_v21 = vadd.f32 %v1370_v61, %v1367_v44  ;;  %v2003_v44 = vld [vmem:[%s3713_s2] sm:$0xf] }
 0x25c   : > { %v3400_v22 = vmul.f32 %v1452_v56, %v1128_v32  ;;  %v3402_v53 = vmul.f32 0.5, %v1151_v10  ;;  %v1156_v57 = vmul.f32 0.044715, %v1152_v52  ;;  %v3406_v23 = vadd.f32 %v1282_v59, %v1280_v50  ;;  %2006 = vperm.xlu1 %2560, %v2003_v44  }
 0x25d   : > { %v1157_v24 = vmul.f32 %v1155_v19, %v1151_v10  ;;  %v1199_v37 = vmul.f32 0.044715, %v1195_v30  ;;  %v1200_v38 = vmul.f32 0.044715, %v1196_v54  ;;  %v3410_v39 = vadd.f32 %v1326_v60, %v1324_v34 }
 0x25e   : > { %v1158_v58 = vmul.f32 %v1156_v57, %v1152_v52  ;;  %v1243_v40 = vmul.f32 0.044715, %v1239_v51  ;;  %v1244_v41 = vmul.f32 0.044715, %v1240_v18  ;;  %v3412_v42 = vmul.f32 0.5, %v1152_v52 }
 0x25f   : > { %v1159_v43 = vmul.f32 %v1157_v24, %v1151_v10  ;;  %v1201_v56 = vmul.f32 %v1199_v37, %v1195_v30  ;;  %v1202_v32 = vmul.f32 %v1200_v38, %v1196_v54  ;;  %v3417_v11 = vmul.f32 0.5, %v1195_v30 }
 0x260   : > { %v1160_v59 = vmul.f32 %v1158_v58, %v1152_v52  ;;  %v1245_v12 = vmul.f32 %v1243_v40, %v1239_v51  ;;  %v1246_v14 = vmul.f32 %v1244_v41, %v1240_v18  ;;  %v1287_v29 = vmul.f32 0.044715, %v3386_v17  ;;  %2014 = vperm.xlu1 %2560, %v2011_v48  }
 0x261   : > { %v1161_v60 = vadd.f32 %v1159_v43, %v1151_v10  ;;  %v1203_v15 = vmul.f32 %v1201_v56, %v1195_v30  ;;  %v1204_v16 = vmul.f32 %v1202_v32, %v1196_v54  ;;  %v1288_v50 = vmul.f32 0.044715, %v3406_v23  ;;  %v2101_v43 = vld [vmem:[%s3715_s30] sm:$0xf] }
 0x262   : > { %v1162_v31 = vadd.f32 %v1160_v59, %v1152_v52  ;;  %v1247_v49 = vmul.f32 %v1245_v12, %v1239_v51  ;;  %v1248_v33 = vmul.f32 %v1246_v14, %v1240_v18  ;;  %v1289_v24 = vmul.f32 %v1287_v29, %v3386_v17 }
 0x263   : > { %v1163_v34 = vmul.f32 0.7978846, %v1161_v60  ;;  %v1205_v19 = vadd.f32 %v1203_v15, %v1195_v30  ;;  %v1206_v57 = vadd.f32 %v1204_v16, %v1196_v54  ;;  %v1290_v58 = vmul.f32 %v1288_v50, %v3406_v23 }
 0x264   : > { %v1164_v37 = vmul.f32 0.7978846, %v1162_v31  ;;  %v1249_v10 = vadd.f32 %v1247_v49, %v1239_v51  ;;  %v1250_v38 = vadd.f32 %v1248_v33, %v1240_v18  ;;  %v1291_v52 = vmul.f32 %v1289_v24, %v3386_v17  ;;  %2104 = vperm.xlu1 %2560, %v2101_v43  }
 0x265   : > { %2758 = vtanh.f32 %v1163_v34  ;;  %v1207_v40 = vmul.f32 0.7978846, %v1205_v19  ;;  %v1208_v41 = vmul.f32 0.7978846, %v1206_v57  ;;  %v1292_v32 = vmul.f32 %v1290_v58, %v3406_v23 }
 0x266   : > { %2760 = vtanh.f32 %v1164_v37  ;;  %v1251_v30 = vmul.f32 0.7978846, %v1249_v10  ;;  %v1252_v56 = vmul.f32 0.7978846, %v1250_v38  ;;  %v3431_v44 = vmul.f32 0.5, %v1196_v54 }
 0x267   : > { %2762 = vtanh.f32 %v1207_v40  ;;  %v3433_v59 = vmul.f32 0.5, %v1239_v51  ;;  %v1293_v12 = vadd.f32 %v1291_v52, %v3386_v17  ;;  %v1294_v14 = vadd.f32 %v1292_v32, %v3406_v23 }
 0x268   : > { %2764 = vtanh.f32 %v1208_v41  ;;  %v1331_v60 = vmul.f32 0.044715, %v3390_v55  ;;  %v1332_v15 = vmul.f32 0.044715, %v3410_v39  ;;  %v3439_v16 = vmul.f32 0.5, %v1240_v18 }
 0x269   : > { %2766 = vtanh.f32 %v1251_v30  ;;  %v1295_v29 = vmul.f32 0.7978846, %v1293_v12  ;;  %v3444_v51 = vadd.f32 %v1370_v61, %v3374_v35  ;;  %v1296_v54 = vmul.f32 0.7978846, %v1294_v14 }
 0x26a   : > { %2768 = vtanh.f32 %v1252_v56  ;;  %v1333_v48 = vmul.f32 %v1331_v60, %v3390_v55  ;;  %v1334_v31 = vmul.f32 %v1332_v15, %v3410_v39  ;;  %v1285_v49 = vmul.f32 0.5, %v3386_v17 }
 0x26b   : > { %2770 = vtanh.f32 %v1295_v29  ;;  %v1375_v33 = vmul.f32 0.044715, %v3396_v21  ;;  %v1376_v18 = vmul.f32 0.044715, %v3444_v51  ;;  %v3456_v61 = vadd.f32 %v1414_v63, %v3347_v45 }
 0x26c   : > { %2772 = vtanh.f32 %v1296_v54  ;;  %v1335_v50 = vmul.f32 %v1333_v48, %v3390_v55  ;;  %v1336_v34 = vmul.f32 %v1334_v31, %v3410_v39  ;;  %v3463_v17 = vadd.f32 %v1414_v63, %v3382_v36 }
 0x26d   : > { %v1377_v35 = vmul.f32 %v1375_v33, %v3396_v21  ;;  %v1378_v19 = vmul.f32 %v1376_v18, %v3444_v51  ;;  %v1456_v57 = vadd.f32 %v3400_v22, %v3328_v25  ;;  %v1286_v24 = vmul.f32 0.5, %v3406_v23 }
 0x26e   : > { %v1337_v37 = vadd.f32 %v1335_v50, %v3390_v55  ;;  %v1338_v10 = vadd.f32 %v1336_v34, %v3410_v39  ;;  %v1419_v45 = vmul.f32 0.044715, %v3456_v61  ;;  %v3472_v58 = vmul.f32 0.5, %v3390_v55 }
 0x26f   : > { %v2759_v38 = vpop.eup %2758  ;;  %v1379_v40 = vmul.f32 %v1377_v35, %v3396_v21  ;;  %v1380_v63 = vmul.f32 %v1378_v19, %v3444_v51  ;;  %v1420_v36 = vmul.f32 0.044715, %v3463_v17 }
 0x270   : > { %v2761_v41 = vpop.eup %2760  ;;  %v1167_v25 = vadd.f32 1.0, %v2759_v38  ;;  %v1339_v22 = vmul.f32 0.7978846, %v1337_v37  ;;  %v1340_v23 = vmul.f32 0.7978846, %v1338_v10  ;;  %v1421_v52 = vmul.f32 %v1419_v45, %v3456_v61 }
 0x271   : > { %v2763_v43 = vpop.eup %2762  ;;  %v1168_v30 = vadd.f32 1.0, %v2761_v41  ;;  %v1381_v56 = vadd.f32 %v1379_v40, %v3396_v21  ;;  %v1382_v55 = vadd.f32 %v1380_v63, %v3444_v51  ;;  %v1422_v32 = vmul.f32 %v1420_v36, %v3463_v17 }
 0x272   : > { %v2765_v12 = vpop.eup %2764  ;;  %v1169_v14 = vmul.f32 %v1167_v25, %v3402_v53  ;;  %v1211_v60 = vadd.f32 1.0, %v2763_v43  ;;  %2774 = vtanh.f32 %v1339_v22  ;;  %v1423_v15 = vmul.f32 %v1421_v52, %v3456_v61 }
 0x273   : > { %v2767_v29 = vpop.eup %2766  ;;  %v1170_v54 = vmul.f32 %v1168_v30, %v3412_v42  ;;  %v1212_v48 = vadd.f32 1.0, %v2765_v12  ;;  %2776 = vtanh.f32 %v1340_v23  ;;  %v1383_v31 = vmul.f32 0.7978846, %v1381_v56 }
 0x274   : > { %v2769_v33 = vpop.eup %2768  ;;  %v1173_v18 = vmul.f32 %v1172_v2, %v1169_v14  ;;  %v3487_v50 = vmul.f32 %v1211_v60, %v3417_v11  ;;  %v1255_v53 = vadd.f32 1.0, %v2767_v29  ;;  %v1384_v34 = vmul.f32 0.7978846, %v1382_v55 }
 0x275   : > { %v2771_v35 = vpop.eup %2770  ;;  %v1174_v19 = vmul.f32 %v1172_v2, %v1170_v54  ;;  %v3492_v37 = vmul.f32 %v1212_v48, %v3431_v44  ;;  %v1256_v42 = vadd.f32 1.0, %v2769_v33  ;;  %2778 = vtanh.f32 %v1383_v31 }
 0x276   : > { %v2773_v10 = vpop.eup %2772  ;;  %v1175_v45 = vadd.f32 %v1173_v18, %v1134_v62  ;;  %v1217_v38 = vmul.f32 %v1216_v3, %v3487_v50  ;;  %v1299_v40 = vadd.f32 1.0, %v2771_v35  ;;  %v1330_v11 = vmul.f32 0.5, %v3410_v39 }
 0x277   : > { %v1176_v63 = vadd.f32 %v1174_v19, %v1134_v62  ;;  %v1218_v2 = vmul.f32 %v1216_v3, %v3492_v37  ;;  %v3506_v44 = vmul.f32 %v1256_v42, %v3439_v16  ;;  %v1300_v36 = vadd.f32 1.0, %v2773_v10 }
 0x278   : > { %v3509_v41 = vmul.f32 %v1255_v53, %v3433_v59  ;;  %v3511_v25 = vmul.f32 %v1299_v40, %v1285_v49  ;;  %2780 = vtanh.f32 %v1384_v34  ;;  %v1424_v39 = vmul.f32 %v1422_v32, %v3463_v17 }
 0x279   : > { %v1220_v62 = vadd.f32 %v1218_v2, %v1176_v63  ;;  %v1262_v22 = vmul.f32 %v1260_v4, %v3506_v44  ;;  %v3517_v3 = vmul.f32 %v1300_v36, %v1286_v24  ;;  %v1425_v16 = vadd.f32 %v1423_v15, %v3456_v61 }
 0x27a   : > { %v1373_v59 = vmul.f32 0.5, %v3396_v21  ;;  %v1426_v49 = vadd.f32 %v1424_v39, %v3463_v17  ;;  %v3527_v23 = vadd.f32 %v1458_v0, %v3349_v46  ;;  %v3531_v52 = vadd.f32 %v1458_v0, %v1456_v57 }
 0x27b   : > { %v1264_v43 = vadd.f32 %v1262_v22, %v1220_v62  ;;  %v1306_v24 = vmul.f32 %v1304_v5, %v3517_v3  ;;  %v1427_v30 = vmul.f32 0.7978846, %v1425_v16  ;;  %v1219_v56 = vadd.f32 %v1217_v38, %v1175_v45 }
 0x27c   : > { %v2775_v55 = vpop.eup %2774  ;;  %v1261_v32 = vmul.f32 %v1260_v4, %v3509_v41  ;;  %v1305_v21 = vmul.f32 %v1304_v5, %v3511_v25  ;;  %v1428_v46 = vmul.f32 0.7978846, %v1426_v49  ;;  %v1463_v12 = vmul.f32 0.044715, %v3527_v23 }
 0x27d   : > { %v2777_v0 = vpop.eup %2776  ;;  %v1308_v57 = vadd.f32 %v1306_v24, %v1264_v43  ;;  %v1343_v60 = vadd.f32 1.0, %v2775_v55  ;;  %2782 = vtanh.f32 %v1427_v30  ;;  %v1464_v15 = vmul.f32 0.044715, %v3531_v52 }
 0x27e   : > { %v1344_v29 = vadd.f32 1.0, %v2777_v0  ;;  %2784 = vtanh.f32 %v1428_v46  ;;  %v1465_v4 = vmul.f32 %v1463_v12, %v3527_v23  ;;  %v1263_v48 = vadd.f32 %v1261_v32, %v1219_v56 }
 0x27f   : > { %v2779_v5 = vpop.eup %2778  ;;  %v1345_v31 = vmul.f32 %v1343_v60, %v3472_v58  ;;  %v1466_v33 = vmul.f32 %v1464_v15, %v3531_v52  ;;  %v1179_v18 = vmul.f32 %v1178_v27, %v1169_v14  ;;  %v1180_v53 = vmul.f32 %v1178_v27, %v1170_v54 }
 0x280   : > { %v1346_v34 = vmul.f32 %v1344_v29, %v1330_v11  ;;  %v1387_v35 = vadd.f32 1.0, %v2779_v5  ;;  %v1467_v19 = vmul.f32 %v1465_v4, %v3527_v23  ;;  %v1307_v42 = vadd.f32 %v1305_v21, %v1263_v48 }
 0x281   : > { %v1349_v10 = vmul.f32 %v1348_v7, %v1345_v31  ;;  %v1468_v45 = vmul.f32 %v1466_v33, %v3531_v52  ;;  %v1182_v58 = vadd.f32 %v1180_v53, %v1137_v47  ;;  %v1398_v38 = vstv %s3520_s7 }
 0x282   : > { %v2781_v40 = vpop.eup %2780  ;;  %v1350_v14 = vmul.f32 %v1348_v7, %v1346_v34  ;;  %v1374_v27 = vmul.f32 0.5, %v3444_v51  ;;  %v1389_v54 = vmul.f32 %v1387_v35, %v1373_v59  ;;  %v1469_v11 = vadd.f32 %v1467_v19, %v3527_v23 }
 0x283   : > { %v1388_v63 = vadd.f32 1.0, %v2781_v40  ;;  %v1470_v2 = vadd.f32 %v1468_v45, %v3531_v52  ;;  %v1351_v36 = vadd.f32 %v1349_v10, %v1307_v42  ;;  %v1224_v39 = vmul.f32 %v1222_v26, %v3492_v37 }
 0x284   : > { %v1352_v62 = vadd.f32 %v1350_v14, %v1308_v57  ;;  %v1393_v7 = vmul.f32 %v1392_v8, %v1389_v54  ;;  %v1471_v22 = vmul.f32 0.7978846, %v1469_v11  ;;  %v1181_v51 = vadd.f32 %v1179_v18, %v1137_v47 }
 0x285   : > { %v1390_v16 = vmul.f32 %v1388_v63, %v1374_v27  ;;  %v1472_v59 = vmul.f32 0.7978846, %v1470_v2  ;;  %v1226_v49 = vadd.f32 %v1224_v39, %v1182_v58  ;;  %v1268_v43 = vmul.f32 %v1266_v6, %v3506_v44 }
 0x286   : > { %v1417_v24 = vmul.f32 0.5, %v3456_v61  ;;  %2786 = vtanh.f32 %v1471_v22  ;;  %v1395_v30 = vadd.f32 %v1393_v7, %v1351_v36  ;;  %v1223_v37 = vmul.f32 %v1222_v26, %v3487_v50 }
 0x287   : > { %v2783_v56 = vpop.eup %2782  ;;  %v1394_v55 = vmul.f32 %v1392_v8, %v1390_v16  ;;  %2788 = vtanh.f32 %v1472_v59  ;;  %v1270_v47 = vadd.f32 %v1268_v43, %v1226_v49  ;;  %v1312_v32 = vmul.f32 %v1310_v28, %v3517_v3  ;;  %v2711_v59 = vld [vmem:[#allocation5 + $0x114] ss:$8 sps:$4 sm:$0xff]   ;;  %v2709_v49 = vld [vmem:[#allocation5 + $0x110] ss:$8 sps:$4 sm:$0xff]   ;;  %v2714_v43 = vld [vmem:[#allocation5 + $0x124] ss:$8 sps:$4 sm:$0xff]  }
 0x288   : > { %v2785_v21 = vpop.eup %2784  ;;  %v1418_v44 = vmul.f32 0.5, %v3463_v17  ;;  %v1431_v46 = vadd.f32 1.0, %v2783_v56  ;;  %v1267_v61 = vmul.f32 %v1266_v6, %v3509_v41  ;;  %v1356_v26 = vmul.f32 %v1354_v13, %v1346_v34  ;;  %v2720_v56 = vld [vmem:[#allocation5 + $0x144] ss:$8 sps:$4 sm:$0xff]  }
 0x289   : > { %v1396_v50 = vadd.f32 %v1394_v55, %v1352_v62  ;;  %v1432_v8 = vadd.f32 1.0, %v2785_v21  ;;  %v1314_v12 = vadd.f32 %v1312_v32, %v1270_v47  ;;  %v1225_v0 = vadd.f32 %v1223_v37, %v1181_v51  ;;  %v2706_v51 = vld [vmem:[#allocation5 + $0x100] ss:$8 sps:$4 sm:$0xff]   ;;  %v2715_v37 = vld [vmem:[#allocation5 + $0x130] ss:$8 sps:$4 sm:$0xff]  }
 0x28a   : > { %v1433_v57 = vmul.f32 %v1431_v46, %v1417_v24  ;;  %v1311_v3 = vmul.f32 %v1310_v28, %v3511_v25  ;;  %v1442_v17 = vstv %s3562_s10  ;;  %v1400_v6 = vmul.f32 %v1398_v38, %v1390_v16  ;;  %v2712_v24 = vld [vmem:[#allocation5 + $0x120] ss:$8 sps:$4 sm:$0xff]   ;;  %v2723_v47 = vld [vmem:[#allocation5 + $0x154] ss:$8 sps:$4 sm:$0xff]   ;;  %v2721_v32 = vld [vmem:[#allocation5 + $0x150] ss:$8 sps:$4 sm:$0xff]  }
 0x28b   : > { %v1434_v60 = vmul.f32 %v1432_v8, %v1418_v44  ;;  %v1358_v15 = vadd.f32 %v1356_v26, %v1314_v12  ;;  %v1269_v41 = vadd.f32 %v1267_v61, %v1225_v0  ;;  %v1355_v4 = vmul.f32 %v1354_v13, %v1345_v31  ;;  %v2718_v55 = vld [vmem:[#allocation5 + $0x140] ss:$8 sps:$4 sm:$0xff]   ;;  %v2726_v21 = vld [vmem:[#allocation5 + $0x164] ss:$8 sps:$4 sm:$0xff]   ;;  %v2729_v46 = vld [vmem:[#allocation5 + $0x174] ss:$8 sps:$4 sm:$0xff]  }
 0x28c   : > { %v1437_v29 = vmul.f32 %v1436_v9, %v1433_v57  ;;  %v1399_v25 = vmul.f32 %v1398_v38, %v1389_v54  ;;  %v1461_v10 = vmul.f32 0.5, %v3527_v23  ;;  %v1443_v58 = vmul.f32 %v1442_v17, %v1433_v57  ;;  %v2724_v44 = vld [vmem:[#allocation5 + $0x160] ss:$8 sps:$4 sm:$0xff]   ;;  %v2727_v61 = vld [vmem:[#allocation5 + $0x170] ss:$8 sps:$4 sm:$0xff]  }
 0x28d   : > { %v1438_v48 = vmul.f32 %v1436_v9, %v1434_v60  ;;  %v1402_v5 = vadd.f32 %v1400_v6, %v1358_v15  ;;  %v1444_v33 = vmul.f32 %v1442_v17, %v1434_v60  ;;  %v1313_v18 = vadd.f32 %v1311_v3, %v1269_v41  ;;  %v2732_v26 = vld [vmem:[#allocation5 + $0x184] ss:$8 sps:$4 sm:$0xff]   ;;  %v2735_v8 = vld [vmem:[#allocation5 + $0x194] ss:$8 sps:$4 sm:$0xff]   ;;  %v2733_v12 = vld [vmem:[#allocation5 + $0x190] ss:$8 sps:$4 sm:$0xff]  }
 0x28e   : > { %v1439_v53 = vadd.f32 %v1437_v29, %v1395_v30  ;;  %v1462_v13 = vmul.f32 0.5, %v3531_v52  ;;  %v1480_v31 = vstv %s3590_s3  ;;  %v1486_v14 = vstv %s3596_s4  ;;  %v2717_v30 = vld [vmem:[#allocation5 + $0x134] ss:$8 sps:$4 sm:$0xff]   ;;  %v2738_v0 = vld [vmem:[#allocation5 + $0x1a4] ss:$8 sps:$4 sm:$0xff]  }
 0x28f   : > { %v1440_v28 = vadd.f32 %v1438_v48, %v1396_v50  ;;  %v1446_v34 = vadd.f32 %v1444_v33, %v1402_v5  ;;  %v1357_v35 = vadd.f32 %v1355_v4, %v1313_v18  ;;  %v2730_v50 = vld [vmem:[#allocation5 + $0x180] ss:$8 sps:$4 sm:$0xff]   ;;  %v2741_v3 = vld [vmem:[#allocation5 + $0x1b4] ss:$8 sps:$4 sm:$0xff]   ;;  %v2739_v17 = vld [vmem:[#allocation5 + $0x1b0] ss:$8 sps:$4 sm:$0xff]  }
 0x290   : > { %v2787_v19 = vpop.eup %2786  ;;  %v2736_v57 = vld [vmem:[#allocation5 + $0x1a0] ss:$8 sps:$4 sm:$0xff]   ;;  %v2744_v60 = vld [vmem:[#allocation5 + $0x1c4] ss:$8 sps:$4 sm:$0xff]   ;;  %v2747_v6 = vld [vmem:[#allocation5 + $0x1d4] ss:$8 sps:$4 sm:$0xff]  }
 0x291   : > { %v2789_v42 = vpop.eup %2788  ;;  %v1475_v45 = vadd.f32 1.0, %v2787_v19  ;;  %v1401_v40 = vadd.f32 %v1399_v25, %v1357_v35  ;;  %v2742_v15 = vld [vmem:[#allocation5 + $0x1c0] ss:$8 sps:$4 sm:$0xff]   ;;  %v2745_v41 = vld [vmem:[#allocation5 + $0x1d0] ss:$8 sps:$4 sm:$0xff]  }
 0x292   : > { %v1476_v9 = vadd.f32 1.0, %v2789_v42  ;;  %v2750_v29 = vld [vmem:[#allocation5 + $0x1e4] ss:$8 sps:$4 sm:$0xff]   ;;  %v2748_v4 = vld [vmem:[#allocation5 + $0x1e0] ss:$8 sps:$4 sm:$0xff]  }
 0x293   : > { %v1477_v27 = vmul.f32 %v1475_v45, %v1461_v10  ;;  %v1445_v11 = vadd.f32 %v1443_v58, %v1401_v40  ;;  %v2753_v48 = vld [vmem:[#allocation5 + $0x1f4] ss:$8 sps:$4 sm:$0xff]   ;;  %v2751_v5 = vld [vmem:[#allocation5 + $0x1f0] ss:$8 sps:$4 sm:$0xff]  }
 0x294   : > { %v1478_v63 = vmul.f32 %v1476_v9, %v1462_v13 }
 0x295   : > { %v1481_v2 = vmul.f32 %v1480_v31, %v1477_v27  ;;  %v1487_v36 = vmul.f32 %v1486_v14, %v1477_v27 }
 0x296   : > { %v1482_v38 = vmul.f32 %v1480_v31, %v1478_v63  ;;  %v1488_v54 = vmul.f32 %v1486_v14, %v1478_v63 }
 0x297   : > { %v1483_v39 = vadd.f32 %v1481_v2, %v1439_v53  ;;  %v3608_v62 = vadd.f32 %v1487_v36, %v1445_v11  ;;  %v2798_v53 = vld [vmem:[%s3716_s9] sm:$0xff] }
 0x298   : > { %v1484_v7 = vadd.f32 %v1482_v38, %v1440_v28  ;;  %v1490_v23 = vadd.f32 %v1488_v54, %v1446_v34 }
 0x299   : > { %v1491_v16 = vpack.c.bf16 %v1483_v39, %v1483_v39  ;;  %v1493_v33 = vpack.c.bf16 %v3608_v62, %v3608_v62 }
 0x29a   : > { %v1492_v22 = vpack.c.bf16 %v1484_v7, %v1484_v7  ;;  %v1494_v52 = vpack.c.bf16 %v1490_v23, %v1490_v23 }
 0x29c   : > { %1911 = vmatprep.mubr.bf16.mxu0 %v1492_v22 }
 0x29d   : > { %1912 = vmatmul.mubr.bf16.vlgmr.msra.gmra.mrb[0].mxu0 %v1491_v16 }
 0x29e   : > { %1921 = vmatpush1.bf16.msra.mxu0 %v2706_v51  ;;  %1952 = vmatprep.mubr.bf16.mxu0 %v1494_v52 }
 0x29f   : > { %1922 = vmatprep.subr.bf16.mxu0 %v2711_v59 }
 0x2a2   : > { %1923 = vmatpush1.bf16.msra.mxu0 %v2709_v49 }
 0x2a3   : > { %1924 = vmatprep.subr.bf16.mxu0 %v2714_v43 }
 0x2a6   : > { %1925 = vmatpush1.bf16.msra.mxu0 %v2712_v24 }
 0x2a7   : > { %1926 = vmatprep.subr.bf16.mxu0 %v2717_v30 }
 0x2aa   : > { %1927 = vmatpush1.bf16.msra.mxu0 %v2715_v37 }
 0x2ab   : > { %1928 = vmatprep.subr.bf16.mxu0 %v2720_v56 }
 0x2ae   : > { %1929 = vmatpush1.bf16.msra.mxu0 %v2718_v55 }
 0x2af   : > { %1930 = vmatprep.subr.bf16.mxu0 %v2723_v47 }
 0x2b2   : > { %1931 = vmatpush1.bf16.msra.mxu0 %v2721_v32 }
 0x2b3   : > { %1932 = vmatprep.subr.bf16.mxu0 %v2726_v21 }
 0x2b6   : > { %1933 = vmatpush1.bf16.msra.mxu0 %v2724_v44 }
 0x2b7   : > { %1934 = vmatprep.subr.bf16.mxu0 %v2729_v46 }
 0x2ba   : > { %1935 = vmatpush1.bf16.msra.mxu0 %v2727_v61 }
 0x2bb   : > { %1936 = vmatprep.subr.bf16.mxu0 %v2732_v26 }
 0x2be   : > { %1937 = vmatpush1.bf16.msra.mxu0 %v2730_v50 }
 0x2bf   : > { %1938 = vmatprep.subr.bf16.mxu0 %v2735_v8 }
 0x2c2   : > { %1939 = vmatpush1.bf16.msra.mxu0 %v2733_v12 }
 0x2c3   : > { %1940 = vmatprep.subr.bf16.mxu0 %v2738_v0 }
 0x2c6   : > { %1941 = vmatpush1.bf16.msra.mxu0 %v2736_v57 }
 0x2c7   : > { %1942 = vmatprep.subr.bf16.mxu0 %v2741_v3 }
 0x2ca   : > { %1943 = vmatpush1.bf16.msra.mxu0 %v2739_v17 }
 0x2cb   : > { %1944 = vmatprep.subr.bf16.mxu0 %v2744_v60 }
 0x2ce   : > { %1945 = vmatpush1.bf16.msra.mxu0 %v2742_v15 }
 0x2cf   : > { %1946 = vmatprep.subr.bf16.mxu0 %v2747_v6 }
 0x2d2   : > { %1947 = vmatpush1.bf16.msra.mxu0 %v2745_v41  ;;  %v2019_v41 = vld [vmem:[%s3717_s14] sm:$0xf] }
 0x2d3   : > { %1948 = vmatprep.subr.bf16.mxu0 %v2750_v29  ;;  %v2026_v29 = vpop.permute.xlu0 %2025 }
 0x2d6   : > { %1949 = vmatpush1.bf16.msra.mxu0 %v2748_v4 }
 0x2d7   : > { %1950 = vmatprep.subr.bf16.mxu0 %v2753_v48 }
 0x2da   : > { %1951 = vmatpush1.bf16.msra.mxu0 %v2751_v5 }
 0x2db   : > { %v2007_v46 = vpop.permute.xlu1 %2006 }
 0x2dd   : > { %1953 = vmatmul.mubr.bf16.vlgmr.msra.gmra.mrb[0].mxu0 %v1493_v33 }
 0x2de   : > { %2071 = vmatprep.mubr.bf16.mxu0 %v2953_v1 }
 0x2df   : > { %v2015_v57 = vpop.permute.xlu1 %2014 }
 0x3b0   : > { %v1954_v18 = vpop.f32.mrb[0].mxu0 }
 0x3b1   : > { %v3614_v28 = vadd.f32 %v2798_v53, %v1954_v18  ;;  %v1956_v25 = vpop.f32.mrb[1].mxu0 }
 0x3b2   : > { %v3617_v34 = vadd.f32 %v1956_v25, %v3188_v20  ;;  %v1958_v35 = vpop.f32.mrb[2].mxu0 }
 0x3b3   : > { %v1961_v19 = vsel %vm582_vm0, %v3614_v28, 0.0  ;;  %v1959_v42 = vpop.f32.mrb[3].mxu0 }
 0x3b4   : > { %v1962_v10 = vrot.slane %v1961_v19, 4  ;;  %v1968_v45 = vsel %vm582_vm0, %v3617_v34, 0.0 }
 0x3b5   : > { %v1969_v58 = vrot.slane %v1968_v45, 4 }
 0x3b6   : > { %v1963_v40 = vadd.f32 %v1962_v10, %v1961_v19 }
 0x3b7   : > { %v1970_v1 = vadd.f32 %v1969_v58, %v1968_v45 }
 0x3b8   : > { %v1964_v13 = vrot.slane %v1963_v40, 2 }
 0x3b9   : > { %v1971_v9 = vrot.slane %v1970_v1, 2 }
 0x3ba   : > { %v1965_v31 = vadd.f32 %v1964_v13, %v1963_v40 }
 0x3bb   : > { %v1972_v14 = vadd.f32 %v1971_v9, %v1970_v1 }
 0x3bc   : > { %v1966_v27 = vrot.slane %v1965_v31, 1 }
 0x3bd   : > { %v1973_v11 = vrot.slane %v1972_v14, 1 }
 0x3be   : > { %v1967_v20 = vadd.f32 %v1966_v27, %v1965_v31 }
 0x3bf   : > { %v1974_v63 = vadd.f32 %v1973_v11, %v1972_v14 }
 0x3c0   : > { %v1975_v2 = vmul.f32 0.25, %v1967_v20 }
 0x3c1   : > { %v1976_v36 = vmul.f32 0.25, %v1974_v63 }
 0x3c2   : > { %v1977_v38 = vsub.f32 %v3614_v28, %v1975_v2 }
 0x3c3   : > { %v1978_v54 = vsub.f32 %v3617_v34, %v1976_v36 }
 0x3c4   : > { %v1979_v39 = vmul.f32 %v1977_v38, %v1977_v38 }
 0x3c5   : > { %v1980_v62 = vmul.f32 %v1978_v54, %v1978_v54 }
 0x3c6   : > { %v1981_v7 = vsel %vm582_vm0, %v1979_v39, 0.0  ;;  %v2098_v39 = vld [vmem:[%s3719_s24] sm:$0x3] }
 0x3c7   : > { %v1982_v23 = vrot.slane %v1981_v7, 4  ;;  %v1988_v22 = vsel %vm582_vm0, %v1980_v62, 0.0  ;;  %v2105_v62 = vpop.permute.xlu1 %2104 }
 0x3c8   : > { %v1989_v51 = vrot.slane %v1988_v22, 4 }
 0x3c9   : > { %v1983_v16 = vadd.f32 %v1982_v23, %v1981_v7 }
 0x3ca   : > { %v1990_v59 = vadd.f32 %v1989_v51, %v1988_v22 }
 0x3cb   : > { %v1984_v52 = vrot.slane %v1983_v16, 2 }
 0x3cc   : > { %v1991_v49 = vrot.slane %v1990_v59, 2 }
 0x3cd   : > { %v1985_v43 = vadd.f32 %v1984_v52, %v1983_v16 }
 0x3ce   : > { %v1992_v24 = vadd.f32 %v1991_v49, %v1990_v59 }
 0x3cf   : > { %v1986_v30 = vrot.slane %v1985_v43, 1 }
 0x3d0   : > { %v1993_v37 = vrot.slane %v1992_v24, 1 }
 0x3d1   : > { %v1987_v56 = vadd.f32 %v1986_v30, %v1985_v43 }
 0x3d2   : > { %v1994_v55 = vadd.f32 %v1993_v37, %v1992_v24 }
 0x3d3   : > { %v1995_v47 = vmul.f32 0.25, %v1987_v56 }
 0x3d4   : > { %v1996_v32 = vmul.f32 0.25, %v1994_v55 }
 0x3d5   : > { %v1997_v21 = vadd.f32 1e-05, %v1995_v47 }
 0x3d6   : > { %v1998_v44 = vadd.f32 1e-05, %v1996_v32 }
 0x3d7   : > { %2790 = vrsqrt.f32 %v1997_v21 }
 0x3d8   : > { %2792 = vrsqrt.f32 %v1998_v44 }
 0x3e1   : > { %v2791_v61 = vpop.eup %2790 }
 0x3e2   : > { %v2793_v26 = vpop.eup %2792  ;;  %v2001_v50 = vmul.f32 %v2791_v61, %v1977_v38 }
 0x3e3   : > { %v2002_v8 = vmul.f32 %v2793_v26, %v1978_v54 }
 0x3e4   : > { %v2009_v12 = vmul.f32 %v2007_v46, %v2001_v50 }
 0x3e5   : > { %v2010_v0 = vmul.f32 %v2007_v46, %v2002_v8 }
 0x3e6   : > { %v2017_v3 = vadd.f32 %v2015_v57, %v2009_v12 }
 0x3e7   : > { %v2018_v17 = vadd.f32 %v2015_v57, %v2010_v0 }
 0x3e8   : > { %v2020_v60 = vpack.c.bf16 %v2017_v3, %v2017_v3 }
 0x3e9   : > { %v2021_v15 = vpack.c.bf16 %v2018_v17, %v2018_v17 }
 0x3ea   : > { %v2034_v6 = vsel %vm2032_vm1, %v2020_v60, 0 }
 0x3eb   : > { %2470 = vmatprep.subr.msk.bf16.mxu0 %vm2032_vm1, %v2021_v15 }
 0x3ec   : > { %2040 = vmatpush1.bf16.msra.mxu0 %v2034_v6 }
 0x3ef   : > { %2471 = vmatmul.mubr.msk.bf16.vlgmr.msra.gmra.mrb[4].mxu0 %vm2028_vm2, %v2019_v41 }
 0x4c2   : > { %v2073_v4 = vpop.f32.mrb[4].mxu0 }
 0x4c3   : > { %v2074_v48 = vadd.f32 %v2073_v4, %v2026_v29  ;;  %v2075_v5 = vpop.f32.mrb[5].mxu0 }
 0x4c4   : > { %v2076_v33 = vadd.f32 %v2075_v5, %v2026_v29  ;;  %v2077_v18 = vpop.f32.mrb[6].mxu0 }
 0x4c5   : > { %v2082_v53 = vmul.f32 0.044715, %v2074_v48  ;;  %v2078_v25 = vpop.f32.mrb[7].mxu0  ;;  %v2080_v14 = vmul.f32 0.5, %v2074_v48 }
 0x4c6   : > { %v2083_v35 = vmul.f32 0.044715, %v2076_v33  ;;  %v2081_v11 = vmul.f32 0.5, %v2076_v33 }
 0x4c7   : > { %v2084_v19 = vmul.f32 %v2082_v53, %v2074_v48 }
 0x4c8   : > { %v2085_v42 = vmul.f32 %v2083_v35, %v2076_v33 }
 0x4c9   : > { %v2086_v10 = vmul.f32 %v2084_v19, %v2074_v48 }
 0x4ca   : > { %v2087_v45 = vmul.f32 %v2085_v42, %v2076_v33 }
 0x4cb   : > { %v2088_v58 = vadd.f32 %v2086_v10, %v2074_v48 }
 0x4cc   : > { %v2089_v40 = vadd.f32 %v2087_v45, %v2076_v33 }
 0x4cd   : > { %v2090_v1 = vmul.f32 0.7978846, %v2088_v58 }
 0x4ce   : > { %v2091_v13 = vmul.f32 0.7978846, %v2089_v40 }
 0x4cf   : > { %2794 = vtanh.f32 %v2090_v1 }
 0x4d0   : > { %2796 = vtanh.f32 %v2091_v13 }
 0x4d9   : > { %v2795_v9 = vpop.eup %2794 }
 0x4da   : > { %v2797_v31 = vpop.eup %2796  ;;  %v2094_v27 = vadd.f32 1.0, %v2795_v9 }
 0x4db   : > { %v2095_v20 = vadd.f32 1.0, %v2797_v31 }
 0x4dc   : > { %v2096_v63 = vmul.f32 %v2094_v27, %v2080_v14 }
 0x4dd   : > { %v2097_v2 = vmul.f32 %v2095_v20, %v2081_v11 }
 0x4de   : > { %v2099_v36 = vpack.c.bf16 %v2096_v63, %v2096_v63 }
 0x4df   : > { %v2100_v38 = vpack.c.bf16 %v2097_v2, %v2097_v2 }
 0x4e0   : > { %v2112_v54 = vsel %vm582_vm0, %v2099_v36, 0 }
 0x4e1   : > { %2472 = vmatprep.subr.msk.bf16.mxu1 %vm582_vm0, %v2100_v38 }
 0x4e2   : > { %2118 = vmatpush1.bf16.msra.mxu1 %v2112_v54 }
 0x4e5   : > { %2473 = vmatmul.mubr.msk.bf16.vlgmr.msra.gmra.mrb[8].mxu1 %vm2107_vm3, %v2098_v39 }
 0x5b8   : > { %v2151_v7 = vpop.f32.mrb[8].mxu1 }
 0x5b9   : > { %v2152_v23 = vadd.f32 %v2151_v7, %v2105_v62  ;;  %v2153_v22 = vpop.f32.mrb[9].mxu1 }
 0x5ba   : > { %v2154_v51 = vadd.f32 %v2153_v22, %v2105_v62  ;;  %v2155_v16 = vpop.f32.mrb[10].mxu1 }
 0x5bb   : > { %v2158_v59 = vadd.f32 %v3614_v28, %v2152_v23  ;;  %v2156_v52 = vpop.f32.mrb[11].mxu1 }
 0x5bc   : > { %v2159_v49 = vadd.f32 %v3617_v34, %v2154_v51 }
 0x5be   : > { %v2162_v43 = vcombine.low %v2158_v59, %v2159_v49 }
 0x5c0   : > { %2164 = vst [vmem:[%s576_s15] sm:$0xff] %v2162_v43 }
 0x5c1 PF: > { %s3722_s16 = sld [smem:[#allocation18_spill]] }
 0x5c7   : > { %s30_s18 = sadd.s32 1, %s3722_s16  }
 0x5c8   : > { %p27_p2 = scmp.ge.s32.totalorder %s30_s18, 4  }
 0x5ca   :  { %29 = sbr.rel (!%p27_p2) target bundleno = 22 (0x16), region = 136 }
 0x5d1   :  { %2186 = vsyncpa [#allocation3], 1 }
 0x5d2   :  { %2188 = vsyncpa [#allocation3 + $0x1], 1 }
 0x5d3   :  { %2189 = vsyncpa [#allocation6], 1 }
 0x5d4   :  { %2190 = vsyncpa [#allocation4], 1 }
 0x5d5   :  { %2192 = vsyncpa [#allocation4 + $0x1], 1 }
 0x5d6   :  { %2193 = vsyncpa [#allocation9], 1 }
 0x5d7   :  { %2194 = vsyncpa [#allocation12], 1 }

</bundles_post_ra>
